<compile_context>
chip_gen: v6e
topology: v6e:2x2x1
jax: 0.10.0
libtpu: 0.0.40
codegen_flags: <defaults>
</compile_context>

<pallas_src>
import math
import numpy as np
import jax
import jax.numpy as jnp
from jax import lax
from jax.experimental import pallas as pl
from jax.experimental.pallas import tpu as pltpu

# ---- small, module-consistent shapes ----------------------------------------
B, L, H = 2, 8, 32            # batch, seq length, hidden (= embedding) size
NUM_HEADS = 4
KEY_DEPTH = 32                # total_key_depth
VALUE_DEPTH = 32              # total_value_depth
FILTER = 64                   # filter_size
NUM_LAYERS = 2
MAX_LENGTH = 100
EPS = 1e-6
N = B * L                     # flattened token count
DK = KEY_DEPTH // NUM_HEADS
DV = VALUE_DEPTH // NUM_HEADS


# ---- timing / position signals (same math as _gen_timing_signal) -------------
def gen_timing_signal(length, channels, min_timescale=1.0, max_timescale=1.0e4):
    position = np.arange(length)
    num_timescales = channels // 2
    log_timescale_increment = math.log(float(max_timescale) / float(min_timescale)) / (
        float(num_timescales) - 1)
    inv_timescales = min_timescale * np.exp(
        np.arange(num_timescales).astype(np.float64) * -log_timescale_increment)
    scaled_time = np.expand_dims(position, 1) * np.expand_dims(inv_timescales, 0)
    signal = np.concatenate([np.sin(scaled_time), np.cos(scaled_time)], axis=1)
    signal = np.pad(signal, [[0, 0], [0, channels % 2]], 'constant')
    return jnp.asarray(signal.reshape(1, length, channels), dtype=jnp.float32)


# ---- host-side constant helpers ----------------------------------------------
def _boundary_masks():
    # (N,1) masks that zero the conv3 'both' boundary contributions:
    #   mask_dn zeros batch-start rows (no i-1 neighbour), mask_up zeros batch-end rows.
    idx = np.arange(N)
    m_dn = (idx % L != 0).astype(np.float32).reshape(N, 1)
    m_up = (idx % L != L - 1).astype(np.float32).reshape(N, 1)
    return jnp.asarray(m_dn), jnp.asarray(m_up)


def _attn_batch_bias():
    # additive bias: 0 within the same batch element, -1e30 across batch elements
    b = np.arange(N) // L
    bias = np.where(b[:, None] == b[None, :], 0.0, -1e30).astype(np.float32)
    return jnp.asarray(bias)


# ---- Pallas kernel ------------------------------------------------------------
def _layer_norm(x, gamma, beta):
    # torch LayerNorm-in-Model.py: unbiased std, divide by (std + eps)
    mean = jnp.mean(x, axis=-1, keepdims=True)
    var = jnp.sum((x - mean) ** 2, axis=-1, keepdims=True) * (1.0 / (H - 1))
    inv = pl.reciprocal(jnp.sqrt(var) + EPS, approx=True)
    return gamma * (x - mean) * inv + beta


def encoder_kernel(x_ref, sig_ref, bias_ref, mdn_ref, mup_ref, wp_ref,
                   wqkv_ref, wo_ref,
                   g1_ref, b1_ref, g2_ref, b2_ref,
                   w1c_ref, cb1_ref, w2c_ref, cb2_ref,
                   o_ref):
    # ---- hoisted loop-invariant loads / broadcasts (JAX does not CSE these) ----
    bias = bias_ref[...]                                    # (N, N) batch block-diag mask
    mdn = mdn_ref[...]                                      # (N, 1)
    mup = mup_ref[...]                                      # (N, 1)
    wqkv = wqkv_ref[...]                                    # (H, 3*KEY_DEPTH), wq pre-scaled
    wo = wo_ref[...]                                        # (VALUE_DEPTH, H)
    w1c = w1c_ref[...]                                      # (H, 3*FILTER)
    w2c = w2c_ref[...]                                      # (FILTER, 3*H)
    g1 = jnp.broadcast_to(g1_ref[...], (N, H))
    b1 = jnp.broadcast_to(b1_ref[...], (N, H))
    g2 = jnp.broadcast_to(g2_ref[...], (N, H))
    b2 = jnp.broadcast_to(b2_ref[...], (N, H))
    cb1 = jnp.broadcast_to(cb1_ref[...], (N, FILTER))
    cb2 = jnp.broadcast_to(cb2_ref[...], (N, H))

    # input_dropout(p=0) == identity; embedding_proj (Linear, no bias)
    x = jnp.dot(x_ref[...], wp_ref[...], preferred_element_type=jnp.float32)   # (N, H)

    for l in range(NUM_LAYERS):                      # weights shared across hops
        x = x + sig_ref[l]                           # timing + position signal, (N, H)

        # --- multi-head attention (pre-LN), fused QKV + fused output projection ---
        xn = _layer_norm(x, g1, b1)
        qkv = jnp.dot(xn, wqkv, preferred_element_type=jnp.float32)            # (N, 96)
        ctx_parts = []
        for h in range(NUM_HEADS):                   # static 8-lane slices; no extra matmuls
            qh = qkv[:, h * DK:(h + 1) * DK]
            kh = qkv[:, KEY_DEPTH + h * DK:KEY_DEPTH + (h + 1) * DK]
            vh = qkv[:, 2 * KEY_DEPTH + h * DV:2 * KEY_DEPTH + (h + 1) * DV]
            s = lax.dot_general(qh, kh, (((1,), (1,)), ((), ())),
                                preferred_element_type=jnp.float32)            # (N, N)
            s = s + bias                              # forbid cross-batch attention
            s = s - jnp.max(s, axis=-1, keepdims=True)
            e = jnp.exp(s)
            w = e * pl.reciprocal(jnp.sum(e, axis=-1, keepdims=True), approx=True)
            ctx_parts.append(jnp.dot(w, vh, preferred_element_type=jnp.float32))  # (N, DV)
        ctx = jnp.concatenate(ctx_parts, axis=-1)                               # (N, VALUE_DEPTH)
        x = x + jnp.dot(ctx, wo, preferred_element_type=jnp.float32)            # residual

        # --- FFN 'cc' (pre-LN): conv3 'both' -> ReLU -> conv3 'both' -> ReLU ---
        # Conv taps fused into one matmul; +-1 token shifts via XLU roll + boundary mask.
        xn = _layer_norm(x, g2, b2)
        y1 = jnp.dot(xn, w1c, preferred_element_type=jnp.float32)               # (N, 3*FILTER)
        h1 = (cb1
              + mdn * pltpu.roll(y1[:, :FILTER], shift=1, axis=0)               # tap0: x[i-1]
              + y1[:, FILTER:2 * FILTER]                                        # tap1: x[i]
              + mup * pltpu.roll(y1[:, 2 * FILTER:], shift=N - 1, axis=0))      # tap2: x[i+1]
        h1 = jnp.maximum(h1, 0.0)
        y2 = jnp.dot(h1, w2c, preferred_element_type=jnp.float32)               # (N, 3*H)
        h2 = (cb2
              + mdn * pltpu.roll(y2[:, :H], shift=1, axis=0)
              + y2[:, H:2 * H]
              + mup * pltpu.roll(y2[:, 2 * H:], shift=N - 1, axis=0))
        h2 = jnp.maximum(h2, 0.0)       # reproduces ReLU-after-last-conv quirk
        x = x + h2                                    # residual

    o_ref[...] = x


# ---- wrapper ------------------------------------------------------------------
def encoder_forward(inputs, params, timing, pos):
    x2d = inputs.reshape(N, H)

    # precompute both hops' timing+position signal once: (NUM_LAYERS, N, H)
    sig = timing[0, :L, :][None, :, :] + pos[0, :NUM_LAYERS, :][:, None, :]   # (NL, L, H)
    sig = jnp.tile(sig, (1, B, 1))                                            # (NL, N, H)

    bias = _attn_batch_bias()
    mask_dn, mask_up = _boundary_masks()

    scale = DK ** (-0.5)
    # fused QKV weight (query pre-scaled) and fused conv-tap weights
    wqkv = jnp.concatenate([params['wq'] * scale, params['wk'], params['wv']], axis=1)  # (H, 96)
    w1c = jnp.concatenate([params['w1'][0], params['w1'][1], params['w1'][2]], axis=1)  # (H, 192)
    w2c = jnp.concatenate([params['w2'][0], params['w2'][1], params['w2'][2]], axis=1)  # (F, 96)

    vmem = pltpu.MemorySpace.VMEM
    out2d = pl.pallas_call(
        encoder_kernel,
        out_shape=jax.ShapeDtypeStruct((N, H), jnp.float32),
        in_specs=[pl.BlockSpec(memory_space=vmem)] * 16,
        out_specs=pl.BlockSpec(memory_space=vmem),
    )(x2d, sig, bias, mask_dn, mask_up, params['wp'],
      wqkv, params['wo'],
      params['g1'], params['b1'], params['g2'], params['b2'],
      w1c, params['cb1'], w2c, params['cb2'])
    return out2d.reshape(B, L, H)


encoder_forward_jit = jax.jit(encoder_forward)


# ---- pure-JAX reference (for a sanity check) ---------------------------------
def reference_forward(inputs, p, timing, pos):
    def ln(x, g, b):
        mean = x.mean(-1, keepdims=True)
        var = ((x - mean) ** 2).sum(-1, keepdims=True) / (x.shape[-1] - 1)
        return g * (x - mean) / (jnp.sqrt(var) + EPS) + b

    x = inputs @ p['wp']
    for l in range(NUM_LAYERS):
        x = x + timing[:, :L, :] + pos[:, l:l + 1, :]
        xn = ln(x, p['g1'], p['b1'])
        q = (xn @ p['wq']).reshape(B, L, NUM_HEADS, DK).transpose(0, 2, 1, 3) * DK ** -0.5
        k = (xn @ p['wk']).reshape(B, L, NUM_HEADS, DK).transpose(0, 2, 1, 3)
        v = (xn @ p['wv']).reshape(B, L, NUM_HEADS, DV).transpose(0, 2, 1, 3)
        w = jax.nn.softmax(jnp.einsum('bhqd,bhkd->bhqk', q, k), axis=-1)
        ctx = jnp.einsum('bhqk,bhkd->bhqd', w, v).transpose(0, 2, 1, 3).reshape(B, L, VALUE_DEPTH)
        x = x + ctx @ p['wo']
        xn = ln(x, p['g2'], p['b2'])
        xp = jnp.pad(xn, ((0, 0), (1, 1), (0, 0)))
        h1 = p['cb1'] + sum(jnp.einsum('blh,hf->blf', xp[:, t:t + L, :], p['w1'][t]) for t in range(3))
        h1 = jax.nn.relu(h1)
        hp = jnp.pad(h1, ((0, 0), (1, 1), (0, 0)))
        h2 = p['cb2'] + sum(jnp.einsum('blf,fh->blh', hp[:, t:t + L, :], p['w2'][t]) for t in range(3))
        h2 = jax.nn.relu(h2)
        x = x + h2
    return x


# ---- deterministic parameter setup -------------------------------------------
def init_params(keys):
    def nrm(k, shape, scale=0.05):
        return scale * jax.random.normal(k, shape, dtype=jnp.float32)
    return {
        # Linear weights stored pre-transposed to (in, out); Conv1d weights (out,in,k)
        # stored pre-transposed to per-tap (k, in, out).
        'wp':  nrm(keys[0], (H, H)),
        'wq':  nrm(keys[1], (H, KEY_DEPTH)),
        'wk':  nrm(keys[2], (H, KEY_DEPTH)),
        'wv':  nrm(keys[3], (H, VALUE_DEPTH)),
        'wo':  nrm(keys[4], (VALUE_DEPTH, H)),
        'w1':  nrm(keys[5], (3, H, FILTER)),
        'cb1': nrm(keys[6], (1, FILTER)),
        'w2':  nrm(keys[7], (3, FILTER, H)),
        'cb2': nrm(keys[8], (1, H)),
        'g1': jnp.ones((1, H), jnp.float32),   # LayerNorm defaults from __init__
        'b1': jnp.zeros((1, H), jnp.float32),
        'g2': jnp.ones((1, H), jnp.float32),
        'b2': jnp.zeros((1, H), jnp.float32),
    }


if __name__ == "__main__":
    key = jax.random.PRNGKey(0)
    kx, *kw = jax.random.split(key, 11)
    inputs = jax.random.normal(kx, (B, L, H), dtype=jnp.float32)
    params = init_params(kw)
    timing = gen_timing_signal(MAX_LENGTH, H)       # [1, max_length, H]
    pos = gen_timing_signal(NUM_LAYERS, H)          # [1, num_layers, H]

    out = encoder_forward_jit(inputs, params, timing, pos)
    out = jax.block_until_ready(out)

    ref = reference_forward(inputs, params, timing, pos)
    err = float(jnp.max(jnp.abs(out - ref)))
    assert out.shape == (B, L, H) and err < 5e-2, f"mismatch: max abs err {err}"
    print("KERNEL_OK")
</pallas_src>

<mosaic_0001>
module attributes {stable_mosaic.version = 11 : i64} {
  func.func @encoder_kernel(%arg0: memref<16x32xf32, #tpu.memory_space<vmem>>, %arg1: memref<2x16x32xf32, #tpu.memory_space<vmem>>, %arg2: memref<16x16xf32, #tpu.memory_space<vmem>>, %arg3: memref<16x1xf32, #tpu.memory_space<vmem>>, %arg4: memref<16x1xf32, #tpu.memory_space<vmem>>, %arg5: memref<32x32xf32, #tpu.memory_space<vmem>>, %arg6: memref<32x96xf32, #tpu.memory_space<vmem>>, %arg7: memref<32x32xf32, #tpu.memory_space<vmem>>, %arg8: memref<1x32xf32, #tpu.memory_space<vmem>>, %arg9: memref<1x32xf32, #tpu.memory_space<vmem>>, %arg10: memref<1x32xf32, #tpu.memory_space<vmem>>, %arg11: memref<1x32xf32, #tpu.memory_space<vmem>>, %arg12: memref<32x192xf32, #tpu.memory_space<vmem>>, %arg13: memref<1x64xf32, #tpu.memory_space<vmem>>, %arg14: memref<64x96xf32, #tpu.memory_space<vmem>>, %arg15: memref<1x32xf32, #tpu.memory_space<vmem>>, %arg16: memref<16x32xf32, #tpu.memory_space<vmem>>) attributes {dimension_semantics = [], scalar_prefetch = 0 : i64, scratch_operands = 0 : i64, tpu.core_type = #tpu.core_type<tc>} {
    %c0 = arith.constant 0 : index
    %c0_0 = arith.constant 0 : index
    %0 = vector.load %arg2[%c0, %c0_0] : memref<16x16xf32, #tpu.memory_space<vmem>>, vector<16x16xf32>
    %c0_1 = arith.constant 0 : index
    %c0_2 = arith.constant 0 : index
    %1 = vector.load %arg3[%c0_1, %c0_2] : memref<16x1xf32, #tpu.memory_space<vmem>>, vector<16x1xf32>
    %c0_3 = arith.constant 0 : index
    %c0_4 = arith.constant 0 : index
    %2 = vector.load %arg4[%c0_3, %c0_4] : memref<16x1xf32, #tpu.memory_space<vmem>>, vector<16x1xf32>
    %c0_5 = arith.constant 0 : index
    %c0_6 = arith.constant 0 : index
    %3 = vector.load %arg6[%c0_5, %c0_6] : memref<32x96xf32, #tpu.memory_space<vmem>>, vector<32x96xf32>
    %c0_7 = arith.constant 0 : index
    %c0_8 = arith.constant 0 : index
    %4 = vector.load %arg7[%c0_7, %c0_8] : memref<32x32xf32, #tpu.memory_space<vmem>>, vector<32x32xf32>
    %c0_9 = arith.constant 0 : index
    %c0_10 = arith.constant 0 : index
    %5 = vector.load %arg12[%c0_9, %c0_10] : memref<32x192xf32, #tpu.memory_space<vmem>>, vector<32x192xf32>
    %c0_11 = arith.constant 0 : index
    %c0_12 = arith.constant 0 : index
    %6 = vector.load %arg14[%c0_11, %c0_12] : memref<64x96xf32, #tpu.memory_space<vmem>>, vector<64x96xf32>
    %c0_13 = arith.constant 0 : index
    %c0_14 = arith.constant 0 : index
    %7 = vector.load %arg8[%c0_13, %c0_14] : memref<1x32xf32, #tpu.memory_space<vmem>>, vector<1x32xf32>
    %8 = vector.shape_cast %7 : vector<1x32xf32> to vector<1x32xf32>
    %9 = vector.broadcast %8 : vector<1x32xf32> to vector<16x32xf32>
    %c0_15 = arith.constant 0 : index
    %c0_16 = arith.constant 0 : index
    %10 = vector.load %arg9[%c0_15, %c0_16] : memref<1x32xf32, #tpu.memory_space<vmem>>, vector<1x32xf32>
    %11 = vector.shape_cast %10 : vector<1x32xf32> to vector<1x32xf32>
    %12 = vector.broadcast %11 : vector<1x32xf32> to vector<16x32xf32>
    %c0_17 = arith.constant 0 : index
    %c0_18 = arith.constant 0 : index
    %13 = vector.load %arg10[%c0_17, %c0_18] : memref<1x32xf32, #tpu.memory_space<vmem>>, vector<1x32xf32>
    %14 = vector.shape_cast %13 : vector<1x32xf32> to vector<1x32xf32>
    %15 = vector.broadcast %14 : vector<1x32xf32> to vector<16x32xf32>
    %c0_19 = arith.constant 0 : index
    %c0_20 = arith.constant 0 : index
    %16 = vector.load %arg11[%c0_19, %c0_20] : memref<1x32xf32, #tpu.memory_space<vmem>>, vector<1x32xf32>
    %17 = vector.shape_cast %16 : vector<1x32xf32> to vector<1x32xf32>
    %18 = vector.broadcast %17 : vector<1x32xf32> to vector<16x32xf32>
    %c0_21 = arith.constant 0 : index
    %c0_22 = arith.constant 0 : index
    %19 = vector.load %arg13[%c0_21, %c0_22] : memref<1x64xf32, #tpu.memory_space<vmem>>, vector<1x64xf32>
    %20 = vector.shape_cast %19 : vector<1x64xf32> to vector<1x64xf32>
    %21 = vector.broadcast %20 : vector<1x64xf32> to vector<16x64xf32>
    %c0_23 = arith.constant 0 : index
    %c0_24 = arith.constant 0 : index
    %22 = vector.load %arg15[%c0_23, %c0_24] : memref<1x32xf32, #tpu.memory_space<vmem>>, vector<1x32xf32>
    %23 = vector.shape_cast %22 : vector<1x32xf32> to vector<1x32xf32>
    %24 = vector.broadcast %23 : vector<1x32xf32> to vector<16x32xf32>
    %c0_25 = arith.constant 0 : index
    %c0_26 = arith.constant 0 : index
    %25 = vector.load %arg0[%c0_25, %c0_26] : memref<16x32xf32, #tpu.memory_space<vmem>>, vector<16x32xf32>
    %c0_27 = arith.constant 0 : index
    %c0_28 = arith.constant 0 : index
    %26 = vector.load %arg5[%c0_27, %c0_28] : memref<32x32xf32, #tpu.memory_space<vmem>>, vector<32x32xf32>
    %cst = arith.constant dense<0.000000e+00> : vector<16x32xf32>
    %27 = tpu.matmul %25, %26, %cst {dimension_numbers = #tpu.dot_dimension_numbers<[1], [0], [0], [1], [0, 0, 1, 1], [], []>} : vector<16x32xf32>, vector<32x32xf32>, vector<16x32xf32> -> vector<16x32xf32>
    %c0_29 = arith.constant 0 : index
    %c0_30 = arith.constant 0 : index
    %c0_31 = arith.constant 0 : index
    %28 = vector.load %arg1[%c0_29, %c0_30, %c0_31] : memref<2x16x32xf32, #tpu.memory_space<vmem>>, vector<1x16x32xf32>
    %29 = vector.shape_cast %28 : vector<1x16x32xf32> to vector<16x32xf32>
    %30 = arith.addf %27, %29 : vector<16x32xf32>
    %cst_32 = arith.constant dense<0.000000e+00> : vector<16xf32>
    %31 = vector.multi_reduction <add>, %30, %cst_32 [1] : vector<16x32xf32> to vector<16xf32>
    %32 = vector.shape_cast %31 : vector<16xf32> to vector<16x1xf32>
    %cst_33 = arith.constant 3.200000e+01 : f32
    %33 = vector.broadcast %cst_33 : f32 to vector<16x1xf32>
    %34 = arith.divf %32, %33 : vector<16x1xf32>
    %35 = vector.broadcast %34 : vector<16x1xf32> to vector<16x32xf32>
    %36 = arith.subf %30, %35 : vector<16x32xf32>
    %37 = arith.mulf %36, %36 : vector<16x32xf32>
    %cst_34 = arith.constant dense<0.000000e+00> : vector<16xf32>
    %38 = vector.multi_reduction <add>, %37, %cst_34 [1] : vector<16x32xf32> to vector<16xf32>
    %39 = vector.shape_cast %38 : vector<16xf32> to vector<16x1xf32>
    %cst_35 = arith.constant 0.0322580636 : f32
    %40 = vector.broadcast %cst_35 : f32 to vector<16x1xf32>
    %41 = arith.mulf %39, %40 : vector<16x1xf32>
    %42 = math.sqrt %41 : vector<16x1xf32>
    %cst_36 = arith.constant 9.99999997E-7 : f32
    %43 = vector.broadcast %cst_36 : f32 to vector<16x1xf32>
    %44 = arith.addf %42, %43 : vector<16x1xf32>
    %45 = tpu.reciprocal %44 {approx = true} : vector<16x1xf32> -> vector<16x1xf32>
    %46 = vector.broadcast %34 : vector<16x1xf32> to vector<16x32xf32>
    %47 = arith.subf %30, %46 : vector<16x32xf32>
    %48 = arith.mulf %9, %47 : vector<16x32xf32>
    %49 = vector.broadcast %45 : vector<16x1xf32> to vector<16x32xf32>
    %50 = arith.mulf %48, %49 : vector<16x32xf32>
    %51 = arith.addf %50, %12 : vector<16x32xf32>
    %cst_37 = arith.constant dense<0.000000e+00> : vector<16x96xf32>
    %52 = tpu.matmul %51, %3, %cst_37 {dimension_numbers = #tpu.dot_dimension_numbers<[1], [0], [0], [1], [0, 0, 1, 1], [], []>} : vector<16x32xf32>, vector<32x96xf32>, vector<16x96xf32> -> vector<16x96xf32>
    %53 = vector.extract_strided_slice %52 {offsets = [0, 0], sizes = [16, 8], strides = [1, 1]} : vector<16x96xf32> to vector<16x8xf32>
    %54 = vector.extract_strided_slice %52 {offsets = [0, 32], sizes = [16, 8], strides = [1, 1]} : vector<16x96xf32> to vector<16x8xf32>
    %55 = vector.extract_strided_slice %52 {offsets = [0, 64], sizes = [16, 8], strides = [1, 1]} : vector<16x96xf32> to vector<16x8xf32>
    %cst_38 = arith.constant dense<0.000000e+00> : vector<16x16xf32>
    %56 = tpu.matmul %53, %54, %cst_38 {dimension_numbers = #tpu.dot_dimension_numbers<[1], [1], [0], [0], [0, 0, 1, 0], [], []>} : vector<16x8xf32>, vector<16x8xf32>, vector<16x16xf32> -> vector<16x16xf32>
    %57 = arith.addf %56, %0 : vector<16x16xf32>
    %cst_39 = arith.constant dense<0xFF800000> : vector<16xf32>
    %58 = vector.multi_reduction <maximumf>, %57, %cst_39 [1] : vector<16x16xf32> to vector<16xf32>
    %59 = vector.shape_cast %58 : vector<16xf32> to vector<16x1xf32>
    %60 = vector.broadcast %59 : vector<16x1xf32> to vector<16x16xf32>
    %61 = arith.subf %57, %60 : vector<16x16xf32>
    %62 = math.exp %61 : vector<16x16xf32>
    %cst_40 = arith.constant dense<0.000000e+00> : vector<16xf32>
    %63 = vector.multi_reduction <add>, %62, %cst_40 [1] : vector<16x16xf32> to vector<16xf32>
    %64 = vector.shape_cast %63 : vector<16xf32> to vector<16x1xf32>
    %65 = tpu.reciprocal %64 {approx = true} : vector<16x1xf32> -> vector<16x1xf32>
    %66 = vector.broadcast %65 : vector<16x1xf32> to vector<16x16xf32>
    %67 = arith.mulf %62, %66 : vector<16x16xf32>
    %cst_41 = arith.constant dense<0.000000e+00> : vector<16x8xf32>
    %68 = tpu.matmul %67, %55, %cst_41 {dimension_numbers = #tpu.dot_dimension_numbers<[1], [0], [0], [1], [0, 0, 1, 1], [], []>} : vector<16x16xf32>, vector<16x8xf32>, vector<16x8xf32> -> vector<16x8xf32>
    %69 = vector.extract_strided_slice %52 {offsets = [0, 8], sizes = [16, 8], strides = [1, 1]} : vector<16x96xf32> to vector<16x8xf32>
    %70 = vector.extract_strided_slice %52 {offsets = [0, 40], sizes = [16, 8], strides = [1, 1]} : vector<16x96xf32> to vector<16x8xf32>
    %71 = vector.extract_strided_slice %52 {offsets = [0, 72], sizes = [16, 8], strides = [1, 1]} : vector<16x96xf32> to vector<16x8xf32>
    %cst_42 = arith.constant dense<0.000000e+00> : vector<16x16xf32>
    %72 = tpu.matmul %69, %70, %cst_42 {dimension_numbers = #tpu.dot_dimension_numbers<[1], [1], [0], [0], [0, 0, 1, 0], [], []>} : vector<16x8xf32>, vector<16x8xf32>, vector<16x16xf32> -> vector<16x16xf32>
    %73 = arith.addf %72, %0 : vector<16x16xf32>
    %cst_43 = arith.constant dense<0xFF800000> : vector<16xf32>
    %74 = vector.multi_reduction <maximumf>, %73, %cst_43 [1] : vector<16x16xf32> to vector<16xf32>
    %75 = vector.shape_cast %74 : vector<16xf32> to vector<16x1xf32>
    %76 = vector.broadcast %75 : vector<16x1xf32> to vector<16x16xf32>
    %77 = arith.subf %73, %76 : vector<16x16xf32>
    %78 = math.exp %77 : vector<16x16xf32>
    %cst_44 = arith.constant dense<0.000000e+00> : vector<16xf32>
    %79 = vector.multi_reduction <add>, %78, %cst_44 [1] : vector<16x16xf32> to vector<16xf32>
    %80 = vector.shape_cast %79 : vector<16xf32> to vector<16x1xf32>
    %81 = tpu.reciprocal %80 {approx = true} : vector<16x1xf32> -> vector<16x1xf32>
    %82 = vector.broadcast %81 : vector<16x1xf32> to vector<16x16xf32>
    %83 = arith.mulf %78, %82 : vector<16x16xf32>
    %cst_45 = arith.constant dense<0.000000e+00> : vector<16x8xf32>
    %84 = tpu.matmul %83, %71, %cst_45 {dimension_numbers = #tpu.dot_dimension_numbers<[1], [0], [0], [1], [0, 0, 1, 1], [], []>} : vector<16x16xf32>, vector<16x8xf32>, vector<16x8xf32> -> vector<16x8xf32>
    %85 = vector.extract_strided_slice %52 {offsets = [0, 16], sizes = [16, 8], strides = [1, 1]} : vector<16x96xf32> to vector<16x8xf32>
    %86 = vector.extract_strided_slice %52 {offsets = [0, 48], sizes = [16, 8], strides = [1, 1]} : vector<16x96xf32> to vector<16x8xf32>
    %87 = vector.extract_strided_slice %52 {offsets = [0, 80], sizes = [16, 8], strides = [1, 1]} : vector<16x96xf32> to vector<16x8xf32>
    %cst_46 = arith.constant dense<0.000000e+00> : vector<16x16xf32>
    %88 = tpu.matmul %85, %86, %cst_46 {dimension_numbers = #tpu.dot_dimension_numbers<[1], [1], [0], [0], [0, 0, 1, 0], [], []>} : vector<16x8xf32>, vector<16x8xf32>, vector<16x16xf32> -> vector<16x16xf32>
    %89 = arith.addf %88, %0 : vector<16x16xf32>
    %cst_47 = arith.constant dense<0xFF800000> : vector<16xf32>
    %90 = vector.multi_reduction <maximumf>, %89, %cst_47 [1] : vector<16x16xf32> to vector<16xf32>
    %91 = vector.shape_cast %90 : vector<16xf32> to vector<16x1xf32>
    %92 = vector.broadcast %91 : vector<16x1xf32> to vector<16x16xf32>
    %93 = arith.subf %89, %92 : vector<16x16xf32>
    %94 = math.exp %93 : vector<16x16xf32>
    %cst_48 = arith.constant dense<0.000000e+00> : vector<16xf32>
    %95 = vector.multi_reduction <add>, %94, %cst_48 [1] : vector<16x16xf32> to vector<16xf32>
    %96 = vector.shape_cast %95 : vector<16xf32> to vector<16x1xf32>
    %97 = tpu.reciprocal %96 {approx = true} : vector<16x1xf32> -> vector<16x1xf32>
    %98 = vector.broadcast %97 : vector<16x1xf32> to vector<16x16xf32>
    %99 = arith.mulf %94, %98 : vector<16x16xf32>
    %cst_49 = arith.constant dense<0.000000e+00> : vector<16x8xf32>
    %100 = tpu.matmul %99, %87, %cst_49 {dimension_numbers = #tpu.dot_dimension_numbers<[1], [0], [0], [1], [0, 0, 1, 1], [], []>} : vector<16x16xf32>, vector<16x8xf32>, vector<16x8xf32> -> vector<16x8xf32>
    %101 = vector.extract_strided_slice %52 {offsets = [0, 24], sizes = [16, 8], strides = [1, 1]} : vector<16x96xf32> to vector<16x8xf32>
    %102 = vector.extract_strided_slice %52 {offsets = [0, 56], sizes = [16, 8], strides = [1, 1]} : vector<16x96xf32> to vector<16x8xf32>
    %103 = vector.extract_strided_slice %52 {offsets = [0, 88], sizes = [16, 8], strides = [1, 1]} : vector<16x96xf32> to vector<16x8xf32>
    %cst_50 = arith.constant dense<0.000000e+00> : vector<16x16xf32>
    %104 = tpu.matmul %101, %102, %cst_50 {dimension_numbers = #tpu.dot_dimension_numbers<[1], [1], [0], [0], [0, 0, 1, 0], [], []>} : vector<16x8xf32>, vector<16x8xf32>, vector<16x16xf32> -> vector<16x16xf32>
    %105 = arith.addf %104, %0 : vector<16x16xf32>
    %cst_51 = arith.constant dense<0xFF800000> : vector<16xf32>
    %106 = vector.multi_reduction <maximumf>, %105, %cst_51 [1] : vector<16x16xf32> to vector<16xf32>
    %107 = vector.shape_cast %106 : vector<16xf32> to vector<16x1xf32>
    %108 = vector.broadcast %107 : vector<16x1xf32> to vector<16x16xf32>
    %109 = arith.subf %105, %108 : vector<16x16xf32>
    %110 = math.exp %109 : vector<16x16xf32>
    %cst_52 = arith.constant dense<0.000000e+00> : vector<16xf32>
    %111 = vector.multi_reduction <add>, %110, %cst_52 [1] : vector<16x16xf32> to vector<16xf32>
    %112 = vector.shape_cast %111 : vector<16xf32> to vector<16x1xf32>
    %113 = tpu.reciprocal %112 {approx = true} : vector<16x1xf32> -> vector<16x1xf32>
    %114 = vector.broadcast %113 : vector<16x1xf32> to vector<16x16xf32>
    %115 = arith.mulf %110, %114 : vector<16x16xf32>
    %cst_53 = arith.constant dense<0.000000e+00> : vector<16x8xf32>
    %116 = tpu.matmul %115, %103, %cst_53 {dimension_numbers = #tpu.dot_dimension_numbers<[1], [0], [0], [1], [0, 0, 1, 1], [], []>} : vector<16x16xf32>, vector<16x8xf32>, vector<16x8xf32> -> vector<16x8xf32>
    %117 = tpu.concatenate %68, %84, %100, %116 in 1 : vector<16x8xf32>, vector<16x8xf32>, vector<16x8xf32>, vector<16x8xf32> -> vector<16x32xf32>
    %cst_54 = arith.constant dense<0.000000e+00> : vector<16x32xf32>
    %118 = tpu.matmul %117, %4, %cst_54 {dimension_numbers = #tpu.dot_dimension_numbers<[1], [0], [0], [1], [0, 0, 1, 1], [], []>} : vector<16x32xf32>, vector<32x32xf32>, vector<16x32xf32> -> vector<16x32xf32>
    %119 = arith.addf %30, %118 : vector<16x32xf32>
    %cst_55 = arith.constant dense<0.000000e+00> : vector<16xf32>
    %120 = vector.multi_reduction <add>, %119, %cst_55 [1] : vector<16x32xf32> to vector<16xf32>
    %121 = vector.shape_cast %120 : vector<16xf32> to vector<16x1xf32>
    %cst_56 = arith.constant 3.200000e+01 : f32
    %122 = vector.broadcast %cst_56 : f32 to vector<16x1xf32>
    %123 = arith.divf %121, %122 : vector<16x1xf32>
    %124 = vector.broadcast %123 : vector<16x1xf32> to vector<16x32xf32>
    %125 = arith.subf %119, %124 : vector<16x32xf32>
    %126 = arith.mulf %125, %125 : vector<16x32xf32>
    %cst_57 = arith.constant dense<0.000000e+00> : vector<16xf32>
    %127 = vector.multi_reduction <add>, %126, %cst_57 [1] : vector<16x32xf32> to vector<16xf32>
    %128 = vector.shape_cast %127 : vector<16xf32> to vector<16x1xf32>
    %cst_58 = arith.constant 0.0322580636 : f32
    %129 = vector.broadcast %cst_58 : f32 to vector<16x1xf32>
    %130 = arith.mulf %128, %129 : vector<16x1xf32>
    %131 = math.sqrt %130 : vector<16x1xf32>
    %cst_59 = arith.constant 9.99999997E-7 : f32
    %132 = vector.broadcast %cst_59 : f32 to vector<16x1xf32>
    %133 = arith.addf %131, %132 : vector<16x1xf32>
    %134 = tpu.reciprocal %133 {approx = true} : vector<16x1xf32> -> vector<16x1xf32>
    %135 = vector.broadcast %123 : vector<16x1xf32> to vector<16x32xf32>
    %136 = arith.subf %119, %135 : vector<16x32xf32>
    %137 = arith.mulf %15, %136 : vector<16x32xf32>
    %138 = vector.broadcast %134 : vector<16x1xf32> to vector<16x32xf32>
    %139 = arith.mulf %137, %138 : vector<16x32xf32>
    %140 = arith.addf %139, %18 : vector<16x32xf32>
    %cst_60 = arith.constant dense<0.000000e+00> : vector<16x192xf32>
    %141 = tpu.matmul %140, %5, %cst_60 {dimension_numbers = #tpu.dot_dimension_numbers<[1], [0], [0], [1], [0, 0, 1, 1], [], []>} : vector<16x32xf32>, vector<32x192xf32>, vector<16x192xf32> -> vector<16x192xf32>
    %142 = vector.extract_strided_slice %141 {offsets = [0, 0], sizes = [16, 64], strides = [1, 1]} : vector<16x192xf32> to vector<16x64xf32>
    %c1_i32 = arith.constant 1 : i32
    %143 = tpu.dynamic_rotate %142 by %c1_i32 dim 0 : vector<16x64xf32>, i32 -> vector<16x64xf32>
    %144 = vector.broadcast %1 : vector<16x1xf32> to vector<16x64xf32>
    %145 = arith.mulf %144, %143 : vector<16x64xf32>
    %146 = arith.addf %21, %145 : vector<16x64xf32>
    %147 = vector.extract_strided_slice %141 {offsets = [0, 64], sizes = [16, 64], strides = [1, 1]} : vector<16x192xf32> to vector<16x64xf32>
    %148 = arith.addf %146, %147 : vector<16x64xf32>
    %149 = vector.extract_strided_slice %141 {offsets = [0, 128], sizes = [16, 64], strides = [1, 1]} : vector<16x192xf32> to vector<16x64xf32>
    %c15_i32 = arith.constant 15 : i32
    %150 = tpu.dynamic_rotate %149 by %c15_i32 dim 0 : vector<16x64xf32>, i32 -> vector<16x64xf32>
    %151 = vector.broadcast %2 : vector<16x1xf32> to vector<16x64xf32>
    %152 = arith.mulf %151, %150 : vector<16x64xf32>
    %153 = arith.addf %148, %152 : vector<16x64xf32>
    %cst_61 = arith.constant 0.000000e+00 : f32
    %154 = vector.broadcast %cst_61 : f32 to vector<16x64xf32>
    %155 = arith.maximumf %153, %154 : vector<16x64xf32>
    %cst_62 = arith.constant dense<0.000000e+00> : vector<16x96xf32>
    %156 = tpu.matmul %155, %6, %cst_62 {dimension_numbers = #tpu.dot_dimension_numbers<[1], [0], [0], [1], [0, 0, 1, 1], [], []>} : vector<16x64xf32>, vector<64x96xf32>, vector<16x96xf32> -> vector<16x96xf32>
    %157 = vector.extract_strided_slice %156 {offsets = [0, 0], sizes = [16, 32], strides = [1, 1]} : vector<16x96xf32> to vector<16x32xf32>
    %c1_i32_63 = arith.constant 1 : i32
    %158 = tpu.dynamic_rotate %157 by %c1_i32_63 dim 0 : vector<16x32xf32>, i32 -> vector<16x32xf32>
    %159 = vector.broadcast %1 : vector<16x1xf32> to vector<16x32xf32>
    %160 = arith.mulf %159, %158 : vector<16x32xf32>
    %161 = arith.addf %24, %160 : vector<16x32xf32>
    %162 = vector.extract_strided_slice %156 {offsets = [0, 32], sizes = [16, 32], strides = [1, 1]} : vector<16x96xf32> to vector<16x32xf32>
    %163 = arith.addf %161, %162 : vector<16x32xf32>
    %164 = vector.extract_strided_slice %156 {offsets = [0, 64], sizes = [16, 32], strides = [1, 1]} : vector<16x96xf32> to vector<16x32xf32>
    %c15_i32_64 = arith.constant 15 : i32
    %165 = tpu.dynamic_rotate %164 by %c15_i32_64 dim 0 : vector<16x32xf32>, i32 -> vector<16x32xf32>
    %166 = vector.broadcast %2 : vector<16x1xf32> to vector<16x32xf32>
    %167 = arith.mulf %166, %165 : vector<16x32xf32>
    %168 = arith.addf %163, %167 : vector<16x32xf32>
    %cst_65 = arith.constant 0.000000e+00 : f32
    %169 = vector.broadcast %cst_65 : f32 to vector<16x32xf32>
    %170 = arith.maximumf %168, %169 : vector<16x32xf32>
    %171 = arith.addf %119, %170 : vector<16x32xf32>
    %c1 = arith.constant 1 : index
    %c0_66 = arith.constant 0 : index
    %c0_67 = arith.constant 0 : index
    %172 = vector.load %arg1[%c1, %c0_66, %c0_67] : memref<2x16x32xf32, #tpu.memory_space<vmem>>, vector<1x16x32xf32>
    %173 = vector.shape_cast %172 : vector<1x16x32xf32> to vector<16x32xf32>
    %174 = arith.addf %171, %173 : vector<16x32xf32>
    %cst_68 = arith.constant dense<0.000000e+00> : vector<16xf32>
    %175 = vector.multi_reduction <add>, %174, %cst_68 [1] : vector<16x32xf32> to vector<16xf32>
    %176 = vector.shape_cast %175 : vector<16xf32> to vector<16x1xf32>
    %cst_69 = arith.constant 3.200000e+01 : f32
    %177 = vector.broadcast %cst_69 : f32 to vector<16x1xf32>
    %178 = arith.divf %176, %177 : vector<16x1xf32>
    %179 = vector.broadcast %178 : vector<16x1xf32> to vector<16x32xf32>
    %180 = arith.subf %174, %179 : vector<16x32xf32>
    %181 = arith.mulf %180, %180 : vector<16x32xf32>
    %cst_70 = arith.constant dense<0.000000e+00> : vector<16xf32>
    %182 = vector.multi_reduction <add>, %181, %cst_70 [1] : vector<16x32xf32> to vector<16xf32>
    %183 = vector.shape_cast %182 : vector<16xf32> to vector<16x1xf32>
    %cst_71 = arith.constant 0.0322580636 : f32
    %184 = vector.broadcast %cst_71 : f32 to vector<16x1xf32>
    %185 = arith.mulf %183, %184 : vector<16x1xf32>
    %186 = math.sqrt %185 : vector<16x1xf32>
    %cst_72 = arith.constant 9.99999997E-7 : f32
    %187 = vector.broadcast %cst_72 : f32 to vector<16x1xf32>
    %188 = arith.addf %186, %187 : vector<16x1xf32>
    %189 = tpu.reciprocal %188 {approx = true} : vector<16x1xf32> -> vector<16x1xf32>
    %190 = vector.broadcast %178 : vector<16x1xf32> to vector<16x32xf32>
    %191 = arith.subf %174, %190 : vector<16x32xf32>
    %192 = arith.mulf %9, %191 : vector<16x32xf32>
    %193 = vector.broadcast %189 : vector<16x1xf32> to vector<16x32xf32>
    %194 = arith.mulf %192, %193 : vector<16x32xf32>
    %195 = arith.addf %194, %12 : vector<16x32xf32>
    %cst_73 = arith.constant dense<0.000000e+00> : vector<16x96xf32>
    %196 = tpu.matmul %195, %3, %cst_73 {dimension_numbers = #tpu.dot_dimension_numbers<[1], [0], [0], [1], [0, 0, 1, 1], [], []>} : vector<16x32xf32>, vector<32x96xf32>, vector<16x96xf32> -> vector<16x96xf32>
    %197 = vector.extract_strided_slice %196 {offsets = [0, 0], sizes = [16, 8], strides = [1, 1]} : vector<16x96xf32> to vector<16x8xf32>
    %198 = vector.extract_strided_slice %196 {offsets = [0, 32], sizes = [16, 8], strides = [1, 1]} : vector<16x96xf32> to vector<16x8xf32>
    %199 = vector.extract_strided_slice %196 {offsets = [0, 64], sizes = [16, 8], strides = [1, 1]} : vector<16x96xf32> to vector<16x8xf32>
    %cst_74 = arith.constant dense<0.000000e+00> : vector<16x16xf32>
    %200 = tpu.matmul %197, %198, %cst_74 {dimension_numbers = #tpu.dot_dimension_numbers<[1], [1], [0], [0], [0, 0, 1, 0], [], []>} : vector<16x8xf32>, vector<16x8xf32>, vector<16x16xf32> -> vector<16x16xf32>
    %201 = arith.addf %200, %0 : vector<16x16xf32>
    %cst_75 = arith.constant dense<0xFF800000> : vector<16xf32>
    %202 = vector.multi_reduction <maximumf>, %201, %cst_75 [1] : vector<16x16xf32> to vector<16xf32>
    %203 = vector.shape_cast %202 : vector<16xf32> to vector<16x1xf32>
    %204 = vector.broadcast %203 : vector<16x1xf32> to vector<16x16xf32>
    %205 = arith.subf %201, %204 : vector<16x16xf32>
    %206 = math.exp %205 : vector<16x16xf32>
    %cst_76 = arith.constant dense<0.000000e+00> : vector<16xf32>
    %207 = vector.multi_reduction <add>, %206, %cst_76 [1] : vector<16x16xf32> to vector<16xf32>
    %208 = vector.shape_cast %207 : vector<16xf32> to vector<16x1xf32>
    %209 = tpu.reciprocal %208 {approx = true} : vector<16x1xf32> -> vector<16x1xf32>
    %210 = vector.broadcast %209 : vector<16x1xf32> to vector<16x16xf32>
    %211 = arith.mulf %206, %210 : vector<16x16xf32>
    %cst_77 = arith.constant dense<0.000000e+00> : vector<16x8xf32>
    %212 = tpu.matmul %211, %199, %cst_77 {dimension_numbers = #tpu.dot_dimension_numbers<[1], [0], [0], [1], [0, 0, 1, 1], [], []>} : vector<16x16xf32>, vector<16x8xf32>, vector<16x8xf32> -> vector<16x8xf32>
    %213 = vector.extract_strided_slice %196 {offsets = [0, 8], sizes = [16, 8], strides = [1, 1]} : vector<16x96xf32> to vector<16x8xf32>
    %214 = vector.extract_strided_slice %196 {offsets = [0, 40], sizes = [16, 8], strides = [1, 1]} : vector<16x96xf32> to vector<16x8xf32>
    %215 = vector.extract_strided_slice %196 {offsets = [0, 72], sizes = [16, 8], strides = [1, 1]} : vector<16x96xf32> to vector<16x8xf32>
    %cst_78 = arith.constant dense<0.000000e+00> : vector<16x16xf32>
    %216 = tpu.matmul %213, %214, %cst_78 {dimension_numbers = #tpu.dot_dimension_numbers<[1], [1], [0], [0], [0, 0, 1, 0], [], []>} : vector<16x8xf32>, vector<16x8xf32>, vector<16x16xf32> -> vector<16x16xf32>
    %217 = arith.addf %216, %0 : vector<16x16xf32>
    %cst_79 = arith.constant dense<0xFF800000> : vector<16xf32>
    %218 = vector.multi_reduction <maximumf>, %217, %cst_79 [1] : vector<16x16xf32> to vector<16xf32>
    %219 = vector.shape_cast %218 : vector<16xf32> to vector<16x1xf32>
    %220 = vector.broadcast %219 : vector<16x1xf32> to vector<16x16xf32>
    %221 = arith.subf %217, %220 : vector<16x16xf32>
    %222 = math.exp %221 : vector<16x16xf32>
    %cst_80 = arith.constant dense<0.000000e+00> : vector<16xf32>
    %223 = vector.multi_reduction <add>, %222, %cst_80 [1] : vector<16x16xf32> to vector<16xf32>
    %224 = vector.shape_cast %223 : vector<16xf32> to vector<16x1xf32>
    %225 = tpu.reciprocal %224 {approx = true} : vector<16x1xf32> -> vector<16x1xf32>
    %226 = vector.broadcast %225 : vector<16x1xf32> to vector<16x16xf32>
    %227 = arith.mulf %222, %226 : vector<16x16xf32>
    %cst_81 = arith.constant dense<0.000000e+00> : vector<16x8xf32>
    %228 = tpu.matmul %227, %215, %cst_81 {dimension_numbers = #tpu.dot_dimension_numbers<[1], [0], [0], [1], [0, 0, 1, 1], [], []>} : vector<16x16xf32>, vector<16x8xf32>, vector<16x8xf32> -> vector<16x8xf32>
    %229 = vector.extract_strided_slice %196 {offsets = [0, 16], sizes = [16, 8], strides = [1, 1]} : vector<16x96xf32> to vector<16x8xf32>
    %230 = vector.extract_strided_slice %196 {offsets = [0, 48], sizes = [16, 8], strides = [1, 1]} : vector<16x96xf32> to vector<16x8xf32>
    %231 = vector.extract_strided_slice %196 {offsets = [0, 80], sizes = [16, 8], strides = [1, 1]} : vector<16x96xf32> to vector<16x8xf32>
    %cst_82 = arith.constant dense<0.000000e+00> : vector<16x16xf32>
    %232 = tpu.matmul %229, %230, %cst_82 {dimension_numbers = #tpu.dot_dimension_numbers<[1], [1], [0], [0], [0, 0, 1, 0], [], []>} : vector<16x8xf32>, vector<16x8xf32>, vector<16x16xf32> -> vector<16x16xf32>
    %233 = arith.addf %232, %0 : vector<16x16xf32>
    %cst_83 = arith.constant dense<0xFF800000> : vector<16xf32>
    %234 = vector.multi_reduction <maximumf>, %233, %cst_83 [1] : vector<16x16xf32> to vector<16xf32>
    %235 = vector.shape_cast %234 : vector<16xf32> to vector<16x1xf32>
    %236 = vector.broadcast %235 : vector<16x1xf32> to vector<16x16xf32>
    %237 = arith.subf %233, %236 : vector<16x16xf32>
    %238 = math.exp %237 : vector<16x16xf32>
    %cst_84 = arith.constant dense<0.000000e+00> : vector<16xf32>
    %239 = vector.multi_reduction <add>, %238, %cst_84 [1] : vector<16x16xf32> to vector<16xf32>
    %240 = vector.shape_cast %239 : vector<16xf32> to vector<16x1xf32>
    %241 = tpu.reciprocal %240 {approx = true} : vector<16x1xf32> -> vector<16x1xf32>
    %242 = vector.broadcast %241 : vector<16x1xf32> to vector<16x16xf32>
    %243 = arith.mulf %238, %242 : vector<16x16xf32>
    %cst_85 = arith.constant dense<0.000000e+00> : vector<16x8xf32>
    %244 = tpu.matmul %243, %231, %cst_85 {dimension_numbers = #tpu.dot_dimension_numbers<[1], [0], [0], [1], [0, 0, 1, 1], [], []>} : vector<16x16xf32>, vector<16x8xf32>, vector<16x8xf32> -> vector<16x8xf32>
    %245 = vector.extract_strided_slice %196 {offsets = [0, 24], sizes = [16, 8], strides = [1, 1]} : vector<16x96xf32> to vector<16x8xf32>
    %246 = vector.extract_strided_slice %196 {offsets = [0, 56], sizes = [16, 8], strides = [1, 1]} : vector<16x96xf32> to vector<16x8xf32>
    %247 = vector.extract_strided_slice %196 {offsets = [0, 88], sizes = [16, 8], strides = [1, 1]} : vector<16x96xf32> to vector<16x8xf32>
    %cst_86 = arith.constant dense<0.000000e+00> : vector<16x16xf32>
    %248 = tpu.matmul %245, %246, %cst_86 {dimension_numbers = #tpu.dot_dimension_numbers<[1], [1], [0], [0], [0, 0, 1, 0], [], []>} : vector<16x8xf32>, vector<16x8xf32>, vector<16x16xf32> -> vector<16x16xf32>
    %249 = arith.addf %248, %0 : vector<16x16xf32>
    %cst_87 = arith.constant dense<0xFF800000> : vector<16xf32>
    %250 = vector.multi_reduction <maximumf>, %249, %cst_87 [1] : vector<16x16xf32> to vector<16xf32>
    %251 = vector.shape_cast %250 : vector<16xf32> to vector<16x1xf32>
    %252 = vector.broadcast %251 : vector<16x1xf32> to vector<16x16xf32>
    %253 = arith.subf %249, %252 : vector<16x16xf32>
    %254 = math.exp %253 : vector<16x16xf32>
    %cst_88 = arith.constant dense<0.000000e+00> : vector<16xf32>
    %255 = vector.multi_reduction <add>, %254, %cst_88 [1] : vector<16x16xf32> to vector<16xf32>
    %256 = vector.shape_cast %255 : vector<16xf32> to vector<16x1xf32>
    %257 = tpu.reciprocal %256 {approx = true} : vector<16x1xf32> -> vector<16x1xf32>
    %258 = vector.broadcast %257 : vector<16x1xf32> to vector<16x16xf32>
    %259 = arith.mulf %254, %258 : vector<16x16xf32>
    %cst_89 = arith.constant dense<0.000000e+00> : vector<16x8xf32>
    %260 = tpu.matmul %259, %247, %cst_89 {dimension_numbers = #tpu.dot_dimension_numbers<[1], [0], [0], [1], [0, 0, 1, 1], [], []>} : vector<16x16xf32>, vector<16x8xf32>, vector<16x8xf32> -> vector<16x8xf32>
    %261 = tpu.concatenate %212, %228, %244, %260 in 1 : vector<16x8xf32>, vector<16x8xf32>, vector<16x8xf32>, vector<16x8xf32> -> vector<16x32xf32>
    %cst_90 = arith.constant dense<0.000000e+00> : vector<16x32xf32>
    %262 = tpu.matmul %261, %4, %cst_90 {dimension_numbers = #tpu.dot_dimension_numbers<[1], [0], [0], [1], [0, 0, 1, 1], [], []>} : vector<16x32xf32>, vector<32x32xf32>, vector<16x32xf32> -> vector<16x32xf32>
    %263 = arith.addf %174, %262 : vector<16x32xf32>
    %cst_91 = arith.constant dense<0.000000e+00> : vector<16xf32>
    %264 = vector.multi_reduction <add>, %263, %cst_91 [1] : vector<16x32xf32> to vector<16xf32>
    %265 = vector.shape_cast %264 : vector<16xf32> to vector<16x1xf32>
    %cst_92 = arith.constant 3.200000e+01 : f32
    %266 = vector.broadcast %cst_92 : f32 to vector<16x1xf32>
    %267 = arith.divf %265, %266 : vector<16x1xf32>
    %268 = vector.broadcast %267 : vector<16x1xf32> to vector<16x32xf32>
    %269 = arith.subf %263, %268 : vector<16x32xf32>
    %270 = arith.mulf %269, %269 : vector<16x32xf32>
    %cst_93 = arith.constant dense<0.000000e+00> : vector<16xf32>
    %271 = vector.multi_reduction <add>, %270, %cst_93 [1] : vector<16x32xf32> to vector<16xf32>
    %272 = vector.shape_cast %271 : vector<16xf32> to vector<16x1xf32>
    %cst_94 = arith.constant 0.0322580636 : f32
    %273 = vector.broadcast %cst_94 : f32 to vector<16x1xf32>
    %274 = arith.mulf %272, %273 : vector<16x1xf32>
    %275 = math.sqrt %274 : vector<16x1xf32>
    %cst_95 = arith.constant 9.99999997E-7 : f32
    %276 = vector.broadcast %cst_95 : f32 to vector<16x1xf32>
    %277 = arith.addf %275, %276 : vector<16x1xf32>
    %278 = tpu.reciprocal %277 {approx = true} : vector<16x1xf32> -> vector<16x1xf32>
    %279 = vector.broadcast %267 : vector<16x1xf32> to vector<16x32xf32>
    %280 = arith.subf %263, %279 : vector<16x32xf32>
    %281 = arith.mulf %15, %280 : vector<16x32xf32>
    %282 = vector.broadcast %278 : vector<16x1xf32> to vector<16x32xf32>
    %283 = arith.mulf %281, %282 : vector<16x32xf32>
    %284 = arith.addf %283, %18 : vector<16x32xf32>
    %cst_96 = arith.constant dense<0.000000e+00> : vector<16x192xf32>
    %285 = tpu.matmul %284, %5, %cst_96 {dimension_numbers = #tpu.dot_dimension_numbers<[1], [0], [0], [1], [0, 0, 1, 1], [], []>} : vector<16x32xf32>, vector<32x192xf32>, vector<16x192xf32> -> vector<16x192xf32>
    %286 = vector.extract_strided_slice %285 {offsets = [0, 0], sizes = [16, 64], strides = [1, 1]} : vector<16x192xf32> to vector<16x64xf32>
    %c1_i32_97 = arith.constant 1 : i32
    %287 = tpu.dynamic_rotate %286 by %c1_i32_97 dim 0 : vector<16x64xf32>, i32 -> vector<16x64xf32>
    %288 = vector.broadcast %1 : vector<16x1xf32> to vector<16x64xf32>
    %289 = arith.mulf %288, %287 : vector<16x64xf32>
    %290 = arith.addf %21, %289 : vector<16x64xf32>
    %291 = vector.extract_strided_slice %285 {offsets = [0, 64], sizes = [16, 64], strides = [1, 1]} : vector<16x192xf32> to vector<16x64xf32>
    %292 = arith.addf %290, %291 : vector<16x64xf32>
    %293 = vector.extract_strided_slice %285 {offsets = [0, 128], sizes = [16, 64], strides = [1, 1]} : vector<16x192xf32> to vector<16x64xf32>
    %c15_i32_98 = arith.constant 15 : i32
    %294 = tpu.dynamic_rotate %293 by %c15_i32_98 dim 0 : vector<16x64xf32>, i32 -> vector<16x64xf32>
    %295 = vector.broadcast %2 : vector<16x1xf32> to vector<16x64xf32>
    %296 = arith.mulf %295, %294 : vector<16x64xf32>
    %297 = arith.addf %292, %296 : vector<16x64xf32>
    %cst_99 = arith.constant 0.000000e+00 : f32
    %298 = vector.broadcast %cst_99 : f32 to vector<16x64xf32>
    %299 = arith.maximumf %297, %298 : vector<16x64xf32>
    %cst_100 = arith.constant dense<0.000000e+00> : vector<16x96xf32>
    %300 = tpu.matmul %299, %6, %cst_100 {dimension_numbers = #tpu.dot_dimension_numbers<[1], [0], [0], [1], [0, 0, 1, 1], [], []>} : vector<16x64xf32>, vector<64x96xf32>, vector<16x96xf32> -> vector<16x96xf32>
    %301 = vector.extract_strided_slice %300 {offsets = [0, 0], sizes = [16, 32], strides = [1, 1]} : vector<16x96xf32> to vector<16x32xf32>
    %c1_i32_101 = arith.constant 1 : i32
    %302 = tpu.dynamic_rotate %301 by %c1_i32_101 dim 0 : vector<16x32xf32>, i32 -> vector<16x32xf32>
    %303 = vector.broadcast %1 : vector<16x1xf32> to vector<16x32xf32>
    %304 = arith.mulf %303, %302 : vector<16x32xf32>
    %305 = arith.addf %24, %304 : vector<16x32xf32>
    %306 = vector.extract_strided_slice %300 {offsets = [0, 32], sizes = [16, 32], strides = [1, 1]} : vector<16x96xf32> to vector<16x32xf32>
    %307 = arith.addf %305, %306 : vector<16x32xf32>
    %308 = vector.extract_strided_slice %300 {offsets = [0, 64], sizes = [16, 32], strides = [1, 1]} : vector<16x96xf32> to vector<16x32xf32>
    %c15_i32_102 = arith.constant 15 : i32
    %309 = tpu.dynamic_rotate %308 by %c15_i32_102 dim 0 : vector<16x32xf32>, i32 -> vector<16x32xf32>
    %310 = vector.broadcast %2 : vector<16x1xf32> to vector<16x32xf32>
    %311 = arith.mulf %310, %309 : vector<16x32xf32>
    %312 = arith.addf %307, %311 : vector<16x32xf32>
    %cst_103 = arith.constant 0.000000e+00 : f32
    %313 = vector.broadcast %cst_103 : f32 to vector<16x32xf32>
    %314 = arith.maximumf %312, %313 : vector<16x32xf32>
    %315 = arith.addf %263, %314 : vector<16x32xf32>
    %c0_104 = arith.constant 0 : index
    %c0_105 = arith.constant 0 : index
    %316 = vector.load %arg16[%c0_104, %c0_105] : memref<16x32xf32, #tpu.memory_space<vmem>>, vector<16x32xf32>
    tpu.vector_store %arg16[%c0_104, %c0_105], %315 {strides = array<i32>} : memref<16x32xf32, #tpu.memory_space<vmem>>, vector<16x32xf32>,
    return
  }
}

</mosaic_0001>

<bundles_post_ra>
// kernel: encoder_forward.1
= control target key start
LH: loop header
LB: loop body
LE: loop exit
PB: predicated region body
PF: predicated region fallthrough
CT: control target
= control target key end

     0   :  { %s4256_s0 = inlined_call_operand.vmem [shape: f32[16,32], index: 0, kind: input, shape index: {}]   ;;  %s4257_s1 = inlined_call_operand.vmem [shape: f32[2,16,32], index: 1, kind: input, shape index: {}]   ;;  %s4258_s2 = inlined_call_operand.vmem [shape: f32[16,16], index: 2, kind: input, shape index: {}]   ;;  %s4259_s3 = inlined_call_operand.vmem [shape: f32[16,1], index: 3, kind: input, shape index: {}]   ;;  %s4260_s4 = inlined_call_operand.vmem [shape: f32[16,1], index: 4, kind: input, shape index: {}]   ;;  %s4261_s5 = inlined_call_operand.vmem [shape: f32[32,32], index: 5, kind: input, shape index: {}]   ;;  %s4262_s6 = inlined_call_operand.vmem [shape: f32[32,96], index: 6, kind: input, shape index: {}]   ;;  %s4263_s7 = inlined_call_operand.vmem [shape: f32[32,32], index: 7, kind: input, shape index: {}]   ;;  %s4264_s8 = inlined_call_operand.vmem [shape: f32[1,32], index: 8, kind: input, shape index: {}]   ;;  %s4265_s9 = inlined_call_operand.vmem [shape: f32[1,32], index: 9, kind: input, shape index: {}]   ;;  %s4266_s10 = inlined_call_operand.vmem [shape: f32[1,32], index: 10, kind: input, shape index: {}]   ;;  %s4267_s11 = inlined_call_operand.vmem [shape: f32[1,32], index: 11, kind: input, shape index: {}]   ;;  %s4268_s12 = inlined_call_operand.vmem [shape: f32[32,192], index: 12, kind: input, shape index: {}]   ;;  %s4269_s13 = inlined_call_operand.vmem [shape: f32[1,64], index: 13, kind: input, shape index: {}]   ;;  %s4270_s14 = inlined_call_operand.vmem [shape: f32[64,96], index: 14, kind: input, shape index: {}]   ;;  %s4271_s15 = inlined_call_operand.vmem [shape: f32[1,32], index: 15, kind: input, shape index: {}]   ;;  %s4272_s16 = inlined_call_operand.hbm [shape: f32[16,32], index: 16, kind: output, shape index: {}]  }
   0x1   :  { %4284 = sst [smem:[#allocation5_spill]] %s4256_s0 }
   0x2   :  { %v131_v0 = vld [vmem:[%s4261_s5 + $0x18] sm:$0xff]  ;;  %v130_v1 = vld [vmem:[%s4261_s5 + $0x10] sm:$0xff]  ;;  %vm134_vm0 = vcmask 261120   ;;  %s4285_s27 = sld [smem:[#allocation5_spill]]  ;;  %v129_v3 = vld [vmem:[%s4261_s5 + $0x8] sm:$0xff] }
   0x3   :  { %3072 = vmatprep.subr.mxu1 %v131_v0 }
   0x4   :  { %3073 = vmatpush3.msra.mxu1 %v131_v0 }
   0x8   :  { %v126_v2 = vld [vmem:[%s4285_s27] sm:$0xff] }
   0x9   :  { %3080 = vmatprep.mubr.msk.f32.mxu1 %vm134_vm0, %v126_v2 }
   0xa   :  { %21 = vsyncpa [#allocation3], 0  ;;  %3074 = vmatprep.subr.mxu1 %v130_v1  ;;  %v128_v4 = vld [vmem:[%s4261_s5] sm:$0xff]  ;;  %v127_v5 = vld [vmem:[%s4285_s27 + $0x8] sm:$0xff]  ;;  %vm348_vm5 = vcmask 64512   ;;  %s3420_s18 = smov 96  }
   0xb   :  { %3075 = vmatpush3.msra.mxu1 %v130_v1  ;;  %v132_v7 = vld [vmem:[%s4257_s1] sm:$0xff]  ;;  %v133_v8 = vld [vmem:[%s4257_s1 + $0x8] sm:$0xff]  ;;  %v3564_v24 = vld [vmem:[%s4262_s6 + $0x18] sm:$0xff]  ;;  %vm432_vm6 = vcmask 130048   ;;  %s3421_s5 = smov 64   ;;  %s3422_s23 = smov 88  }
   0xc   :  { %3076 = vmatprep.subr.mxu1 %v129_v3  ;;  %v3569_v25 = vld [vmem:[%s4262_s6 + $0x10] sm:$0xff]  ;;  %v3576_v26 = vld [vmem:[%s4262_s6 + $0x8] sm:$0xff]  ;;  %v3585_v27 = vld [vmem:[%s4262_s6] sm:$0xff]  ;;  %s3423_s24 = smov 120   ;;  %s3424_s25 = smov 56   ;;  %vm1170_vm7 = vcmask 195584  }
   0xd   :  { %3077 = vmatpush3.msra.mxu1 %v129_v3  ;;  %v2884_v44 = vld [vmem:[%s4264_s8] ss:$0 sm:$0xff]  ;;  %v3616_v58 = vld [vmem:[%s4258_s2 + $0x8] sm:$0xff]  ;;  %s3425_s26 = smov 80   ;;  %s3426_s27 = smov 112   ;;  %vm1435_vm14 = vcmask 523264  }
   0xe   :  { %3078 = vmatprep.subr.mxu1 %v128_v4  ;;  %v2885_v47 = vld [vmem:[%s4265_s9] ss:$0 sm:$0xff]  ;;  %s3427_s28 = smov 48   ;;  %s3428_s29 = smov 72  }
   0xf   :  { %3079 = vmatpush3.msra.mxu1 %v128_v4  ;;  %v3621_v60 = vld [vmem:[%s4258_s2] sm:$0xff]  ;;  %s4282_s6 = smov 104   ;;  %s4280_s30 = smov 40  }
  0x10   :  { %3081 = vmatmul.mubr.msk.f32.vlgmr.msra.gmra.mxu1 %vm134_vm0, %v127_v5  ;;  %3083 = vmatprep.subr.mxu1 %v3564_v24  ;;  %s4276_s0 = smov 8   ;;  %s4274_s17 = smov 16  }
  0x11   :  { %3084 = vmatpush3.msra.mxu1 %v3564_v24  ;;  %s4278_s21 = smov 24   ;;  %s4290_s20 = smov 24  }
  0x12   :  { %3085 = vmatprep.subr.mxu1 %v3569_v25 }
  0x13   :  { %3086 = vmatpush3.msra.mxu1 %v3569_v25 }
  0x14   :  { %3087 = vmatprep.subr.mxu1 %v3576_v26 }
  0x15   :  { %3088 = vmatpush3.msra.mxu1 %v3576_v26 }
  0x16   :  { %3089 = vmatprep.subr.mxu1 %v3585_v27 }
  0x17   :  { %3090 = vmatpush3.msra.mxu1 %v3585_v27 }
  0xd0   :  { %v3082_v6 = vpop.f32.mrf.mxu1 }
  0xd1   :  { %v3551_v11 = vadd.f32 %v3082_v6, %v133_v8 }
  0xd2   :  { %v207_v9 = vpop.f32.mrf.mxu1 }
  0xd3   :  { %v3549_v10 = vadd.f32 %v207_v9, %v132_v7  ;;  %v219_v13 = vsel %vm134_vm0, %v3551_v11, 0.0 }
  0xd5   :  { %v216_v12 = vsel %vm134_vm0, %v3549_v10, 0.0 }
  0xd6   :  { %217 = vadd.xlane.f32.xlu0 %v216_v12 }
  0xda   :  { %220 = vadd.xlane.f32.xlu0 %v219_v13 }
 0x15f   :  { %v218_v14 = vpop.xlane.xlu0 %217 }
 0x160   :  { %v223_v15 = vmul.f32 0.03125, %v218_v14 }
 0x162   :  { %v225_v16 = vsub.f32 %v3549_v10, %v223_v15 }
 0x163   :  { %v221_v17 = vpop.xlane.xlu0 %220 }
 0x164   :  { %v224_v18 = vmul.f32 0.03125, %v221_v17  ;;  %v227_v19 = vmul.f32 %v225_v16, %v225_v16  ;;  %v255_v45 = vmul.f32 %v2884_v44, %v225_v16 }
 0x166   :  { %v226_v20 = vsub.f32 %v3551_v11, %v224_v18  ;;  %v229_v21 = vsel %vm134_vm0, %v227_v19, 0.0 }
 0x167   :  { %230 = vadd.xlane.f32.xlu1 %v229_v21 }
 0x168   :  { %v228_v22 = vmul.f32 %v226_v20, %v226_v20  ;;  %v256_v49 = vmul.f32 %v2884_v44, %v226_v20 }
 0x16a   :  { %v232_v23 = vsel %vm134_vm0, %v228_v22, 0.0 }
 0x16b   :  { %233 = vadd.xlane.f32.xlu1 %v232_v23 }
 0x1f0   :  { %v231_v28 = vpop.xlane.xlu1 %230 }
 0x1f1   :  { %v235_v29 = vmul.f32 0.032258064, %v231_v28 }
 0x1f3   :  { %3297 = vrsqrt.f32 %v235_v29  ;;  %vm239_vm1 = vcmp.eq.f32.partialorder %v235_v29, inf  ;;  %v242_v34 = vand.u32 2147483648, %v235_v29  ;;  %vm241_vm2 = vcmp.eq.f32.partialorder %v235_v29, 0.0 }
 0x1f4   :  { %v234_v30 = vpop.xlane.xlu1 %233 }
 0x1f5   :  { %v236_v31 = vmul.f32 0.032258064, %v234_v30 }
 0x1f7   :  { %3299 = vrsqrt.f32 %v236_v31  ;;  %vm246_vm3 = vcmp.eq.f32.partialorder %v236_v31, inf  ;;  %v249_v40 = vand.u32 2147483648, %v236_v31  ;;  %vm248_vm4 = vcmp.eq.f32.partialorder %v236_v31, 0.0 }
 0x200   :  { %v3298_v32 = vpop.eup %3297 }
 0x201   :  { %v238_v33 = vmul.f32 %v3298_v32, %v235_v29 }
 0x203   :  { %v240_v35 = vsel %vm239_vm1, %v235_v29, %v238_v33 }
 0x204   :  { %v3300_v36 = vpop.eup %3299  ;;  %v243_v37 = vsel %vm241_vm2, %v242_v34, %v240_v35 }
 0x205   :  { %v251_v38 = vadd.f32 1e-06, %v243_v37  ;;  %v245_v39 = vmul.f32 %v3300_v36, %v236_v31 }
 0x207   :  { %3301 = vrcp.f32 %v251_v38  ;;  %v247_v41 = vsel %vm246_vm3, %v236_v31, %v245_v39 }
 0x208   :  { %v250_v42 = vsel %vm248_vm4, %v249_v40, %v247_v41 }
 0x209   :  { %v252_v43 = vadd.f32 1e-06, %v250_v42 }
 0x20b   :  { %3303 = vrcp.f32 %v252_v43 }
 0x214   :  { %v3302_v46 = vpop.eup %3301 }
 0x215   :  { %v257_v48 = vmul.f32 %v3302_v46, %v255_v45 }
 0x217   :  { %v259_v50 = vadd.f32 %v2885_v47, %v257_v48 }
 0x218   :  { %v3304_v51 = vpop.eup %3303 }
 0x219   :  { %3091 = vmatprep.mubr.msk.f32.mxu1 %vm134_vm0, %v259_v50  ;;  %v258_v52 = vmul.f32 %v3304_v51, %v256_v49 }
 0x21b   :  { %v260_v53 = vadd.f32 %v2885_v47, %v258_v52 }
 0x21d   :  { %3092 = vmatmul.mubr.msk.f32.vlgmr.msra.gmra.mxu1 %vm134_vm0, %v260_v53 }
 0x2dd   :  { %v3597_v54 = vpop.f32.mrf.mxu1 }
 0x2de   :  { %346 = vrot.lane.b32.xlu0 %v3597_v54, %s3420_s18 }
 0x2df   :  { %v3601_v55 = vpop.f32.mrf.mxu1 }
 0x2e0   :  { %344 = vrot.lane.b32.xlu1 %v3601_v55, %s3420_s18  ;;  %3098 = vmatprep.mubr.msk.f32.mxu0 %vm348_vm5, %v3601_v55 }
 0x350   :  { %v347_v56 = vpop.permute.xlu0 %346 }
 0x351   :  { %3094 = vmatprep.subr.msk.mxu0 %vm348_vm5, %v347_v56 }
 0x352   :  { %3095 = vmatpush3.xpose.msk.msra.mxu0 %vm348_vm5, %v347_v56  ;;  %v345_v57 = vpop.permute.xlu1 %344 }
 0x353   :  { %3096 = vmatprep.subr.msk.mxu0 %vm348_vm5, %v345_v57 }
 0x356   :  { %3097 = vmatpush3.xpose.msk.msra.mxu0 %vm348_vm5, %v345_v57 }
 0x359   :  { %3099 = vmatmul.mubr.msk.f32.vlgmr.msra.gmra.mxu0 %vm348_vm5, %v3597_v54 }
 0x419   :  { %v3100_v59 = vpop.f32.mrf.mxu0 }
 0x41a   :  { %v429_v61 = vadd.f32 %v3100_v59, %v3616_v58 }
 0x41b   :  { %v423_v62 = vpop.f32.mrf.mxu0 }
 0x41c   :  { %v424_v63 = vadd.f32 %v423_v62, %v3621_v60  ;;  %v436_v0 = vsel %vm432_vm6, %v429_v61, -inf }
 0x41d   :  { %437 = vmax.xlane.f32.xlu0 %v436_v0 }
 0x41e   :  { %v433_v1 = vsel %vm432_vm6, %v424_v63, -inf }
 0x41f   :  { %434 = vmax.xlane.f32.xlu1 %v433_v1 }
 0x4a6   :  { %v438_v2 = vpop.xlane.xlu0 %437 }
 0x4a7   :  { %v440_v3 = vsub.f32 %v429_v61, %v438_v2 }
 0x4a8   :  { %v435_v4 = vpop.xlane.xlu1 %434 }
 0x4a9   :  { %v443_v5 = vmul.f32 1.442695, %v440_v3  ;;  %v439_v6 = vsub.f32 %v424_v63, %v435_v4 }
 0x4ab   :  { %3305 = vpow2.f32 %v443_v5  ;;  %v441_v7 = vmul.f32 1.442695, %v439_v6 }
 0x4ad   :  { %3307 = vpow2.f32 %v441_v7 }
 0x4b8   :  { %v3306_v8 = vpop.eup %3305 }
 0x4b9   :  { %v448_v9 = vsel %vm432_vm6, %v3306_v8, 0.0 }
 0x4ba   :  { %v3308_v12 = vpop.eup %3307  ;;  %449 = vadd.xlane.f32.xlu1 %v448_v9 }
 0x4bb   :  { %v445_v13 = vsel %vm432_vm6, %v3308_v12, 0.0 }
 0x4bc   :  { %446 = vadd.xlane.f32.xlu0 %v445_v13 }
 0x4cb   :  { %455 = vrot.lane.b32.xlu1 %v3601_v55, %s3421_s5 }
 0x4cf   :  { %548 = vrot.lane.b32.xlu1 %v3597_v54, %s3422_s23 }
 0x4d2   :  { %457 = vrot.lane.b32.xlu0 %v3597_v54, %s3421_s5 }
 0x4d3   :  { %546 = vrot.lane.b32.xlu1 %v3601_v55, %s3422_s23 }
 0x4d6   :  { %542 = vrot.lane.b32.xlu0 %v3601_v55, %s3423_s24 }
 0x4d7   :  { %544 = vrot.lane.b32.xlu1 %v3597_v54, %s3423_s24 }
 0x543   :  { %v450_v14 = vpop.xlane.xlu1 %449 }
 0x544   :  { %3309 = vrcp.f32 %v450_v14 }
 0x545   :  { %v447_v15 = vpop.xlane.xlu0 %446 }
 0x546   :  { %3311 = vrcp.f32 %v447_v15 }
 0x547   :  { %v456_v16 = vpop.permute.xlu1 %455 }
 0x549   :  { %v458_v17 = vpop.permute.xlu0 %457 }
 0x54a   :  { %3101 = vmatprep.subr.mxu1 %v458_v17 }
 0x54b   :  { %3102 = vmatpush3.msra.mxu1 %v458_v17  ;;  %v549_v18 = vpop.permute.xlu1 %548 }
 0x54c   :  { %3103 = vmatprep.subr.mxu1 %v456_v16 }
 0x54d   :  { %3104 = vmatpush3.msra.mxu1 %v456_v16  ;;  %v543_v23 = vpop.permute.xlu0 %542 }
 0x54e   :  { %3108 = vmatprep.subr.msk.mxu1 %vm348_vm5, %v549_v18 }
 0x54f   :  { %v547_v28 = vpop.permute.xlu1 %546 }
 0x551   :  { %v3310_v19 = vpop.eup %3309 }
 0x552   :  { %v454_v22 = vmul.f32 %v3310_v19, %v3306_v8 }
 0x553   :  { %v3312_v20 = vpop.eup %3311  ;;  %v545_v29 = vpop.permute.xlu1 %544 }
 0x554   :  { %v453_v21 = vmul.f32 %v3312_v20, %v3308_v12 }
 0x556   :  { %3105 = vmatprep.mubr.msk.f32.mxu1 %vm432_vm6, %v453_v21 }
 0x557   :  { %3106 = vmatmul.mubr.msk.f32.vlgmr.msra.gmra.mxu1 %vm432_vm6, %v454_v22 }
 0x558   :  { %3109 = vmatpush3.xpose.msk.msra.mxu1 %vm348_vm5, %v549_v18  ;;  %3112 = vmatprep.mubr.msk.f32.mxu1 %vm348_vm5, %v543_v23 }
 0x559   :  { %3110 = vmatprep.subr.msk.mxu1 %vm348_vm5, %v547_v28 }
 0x55c   :  { %3111 = vmatpush3.xpose.msk.msra.mxu1 %vm348_vm5, %v547_v28 }
 0x55f   :  { %3113 = vmatmul.mubr.msk.f32.vlgmr.msra.gmra.mxu1 %vm348_vm5, %v545_v29 }
 0x617   :  { %v3649_v30 = vpop.f32.mrf.mxu1 }
 0x619   :  { %v3651_v31 = vpop.f32.mrf.mxu1 }
 0x61f   :  { %v3114_v32 = vpop.f32.mrf.mxu1 }
 0x620   :  { %v630_v33 = vadd.f32 %v3114_v32, %v3616_v58 }
 0x621   :  { %v624_v34 = vpop.f32.mrf.mxu1 }
 0x622   :  { %v625_v35 = vadd.f32 %v624_v34, %v3621_v60  ;;  %v636_v36 = vsel %vm432_vm6, %v630_v33, -inf }
 0x623   :  { %637 = vmax.xlane.f32.xlu1 %v636_v36 }
 0x624   :  { %v633_v37 = vsel %vm432_vm6, %v625_v35, -inf }
 0x625   :  { %634 = vmax.xlane.f32.xlu0 %v633_v37 }
 0x634   :  { %655 = vrot.lane.b32.xlu1 %v3601_v55, %s3424_s25 }
 0x638   :  { %748 = vrot.lane.b32.xlu1 %v3597_v54, %s3425_s26 }
 0x63c   :  { %746 = vrot.lane.b32.xlu1 %v3601_v55, %s3425_s26 }
 0x640   :  { %744 = vrot.lane.b32.xlu1 %v3597_v54, %s3426_s27 }
 0x6ac   :  { %v638_v38 = vpop.xlane.xlu1 %637 }
 0x6ad   :  { %v640_v39 = vsub.f32 %v630_v33, %v638_v38 }
 0x6ae   :  { %v635_v40 = vpop.xlane.xlu0 %634 }
 0x6af   :  { %v643_v41 = vmul.f32 1.442695, %v640_v39  ;;  %v639_v42 = vsub.f32 %v625_v35, %v635_v40 }
 0x6b0   :  { %v656_v50 = vpop.permute.xlu1 %655 }
 0x6b1   :  { %3313 = vpow2.f32 %v643_v41  ;;  %v641_v43 = vmul.f32 1.442695, %v639_v42 }
 0x6b3   :  { %3315 = vpow2.f32 %v641_v43 }
 0x6b4   :  { %v749_v52 = vpop.permute.xlu1 %748 }
 0x6b8   :  { %v747_v62 = vpop.permute.xlu1 %746 }
 0x6bc   :  { %v745_v63 = vpop.permute.xlu1 %744 }
 0x6be   :  { %v3314_v44 = vpop.eup %3313 }
 0x6bf   :  { %v648_v45 = vsel %vm432_vm6, %v3314_v44, 0.0 }
 0x6c0   :  { %v3316_v46 = vpop.eup %3315  ;;  %649 = vadd.xlane.f32.xlu0 %v648_v45 }
 0x6c1   :  { %v645_v47 = vsel %vm432_vm6, %v3316_v46, 0.0 }
 0x6c4   :  { %646 = vadd.xlane.f32.xlu0 %v645_v47 }
 0x6da   :  { %657 = vrot.lane.b32.xlu0 %v3597_v54, %s3424_s25 }
 0x6de   :  { %742 = vrot.lane.b32.xlu0 %v3601_v55, %s3426_s27 }
 0x749   :  { %v650_v48 = vpop.xlane.xlu0 %649 }
 0x74a   :  { %3317 = vrcp.f32 %v650_v48 }
 0x74d   :  { %v647_v49 = vpop.xlane.xlu0 %646 }
 0x74e   :  { %3319 = vrcp.f32 %v647_v49 }
 0x751   :  { %v658_v51 = vpop.permute.xlu0 %657 }
 0x752   :  { %3115 = vmatprep.subr.mxu0 %v658_v51 }
 0x753   :  { %3116 = vmatpush3.msra.mxu0 %v658_v51 }
 0x754   :  { %3117 = vmatprep.subr.mxu0 %v656_v50 }
 0x755   :  { %3118 = vmatpush3.msra.mxu0 %v656_v50  ;;  %v743_v61 = vpop.permute.xlu0 %742 }
 0x756   :  { %3122 = vmatprep.subr.msk.mxu0 %vm348_vm5, %v749_v52 }
 0x757   :  { %v3318_v53 = vpop.eup %3317 }
 0x758   :  { %v654_v59 = vmul.f32 %v3318_v53, %v3314_v44 }
 0x75b   :  { %v3320_v56 = vpop.eup %3319 }
 0x75c   :  { %v653_v57 = vmul.f32 %v3320_v56, %v3316_v46 }
 0x75e   :  { %3119 = vmatprep.mubr.msk.f32.mxu0 %vm432_vm6, %v653_v57 }
 0x75f   :  { %3120 = vmatmul.mubr.msk.f32.vlgmr.msra.gmra.mxu0 %vm432_vm6, %v654_v59 }
 0x760   :  { %3123 = vmatpush3.xpose.msk.msra.mxu0 %vm348_vm5, %v749_v52  ;;  %3126 = vmatprep.mubr.msk.f32.mxu0 %vm348_vm5, %v743_v61 }
 0x761   :  { %3124 = vmatprep.subr.msk.mxu0 %vm348_vm5, %v747_v62 }
 0x764   :  { %3125 = vmatpush3.xpose.msk.msra.mxu0 %vm348_vm5, %v747_v62 }
 0x767   :  { %3127 = vmatmul.mubr.msk.f32.vlgmr.msra.gmra.mxu0 %vm348_vm5, %v745_v63 }
 0x81f   :  { %v3679_v0 = vpop.f32.mrf.mxu0 }
 0x821   :  { %v3681_v1 = vpop.f32.mrf.mxu0 }
 0x827   :  { %v3128_v2 = vpop.f32.mrf.mxu0 }
 0x828   :  { %v830_v3 = vadd.f32 %v3128_v2, %v3616_v58  ;;  %v3744_v2 = vld [vmem:[%s4263_s7 + $0x8] sm:$0xff] }
 0x829   :  { %v824_v4 = vpop.f32.mrf.mxu0 }
 0x82a   :  { %v825_v5 = vadd.f32 %v824_v4, %v3621_v60  ;;  %v836_v6 = vsel %vm432_vm6, %v830_v3, -inf }
 0x82b   :  { %837 = vmax.xlane.f32.xlu1 %v836_v6 }
 0x82c   :  { %v833_v7 = vsel %vm432_vm6, %v825_v5, -inf }
 0x82d   :  { %834 = vmax.xlane.f32.xlu0 %v833_v7 }
 0x83c   :  { %855 = vrot.lane.b32.xlu1 %v3601_v55, %s3427_s28 }
 0x840   :  { %948 = vrot.lane.b32.xlu1 %v3597_v54, %s3428_s29 }
 0x844   :  { %946 = vrot.lane.b32.xlu1 %v3601_v55, %s3428_s29 }
 0x848   :  { %944 = vrot.lane.b32.xlu1 %v3597_v54, %s4282_s6 }
 0x8b4   :  { %v838_v8 = vpop.xlane.xlu1 %837 }
 0x8b5   :  { %v840_v9 = vsub.f32 %v830_v3, %v838_v8  ;;  %v3751_v3 = vld [vmem:[%s4263_s7] sm:$0xff] }
 0x8b6   :  { %v835_v12 = vpop.xlane.xlu0 %834 }
 0x8b7   :  { %v843_v13 = vmul.f32 1.442695, %v840_v9  ;;  %v839_v14 = vsub.f32 %v825_v5, %v835_v12 }
 0x8b8   :  { %v856_v22 = vpop.permute.xlu1 %855 }
 0x8b9   :  { %3321 = vpow2.f32 %v843_v13  ;;  %v841_v15 = vmul.f32 1.442695, %v839_v14 }
 0x8bb   :  { %3323 = vpow2.f32 %v841_v15 }
 0x8bc   :  { %v949_v28 = vpop.permute.xlu1 %948 }
 0x8c0   :  { %v947_v36 = vpop.permute.xlu1 %946 }
 0x8c4   :  { %v945_v37 = vpop.permute.xlu1 %944 }
 0x8c6   :  { %v3322_v16 = vpop.eup %3321 }
 0x8c7   :  { %v848_v17 = vsel %vm432_vm6, %v3322_v16, 0.0 }
 0x8c8   :  { %v3324_v18 = vpop.eup %3323  ;;  %849 = vadd.xlane.f32.xlu0 %v848_v17 }
 0x8c9   :  { %v845_v19 = vsel %vm432_vm6, %v3324_v18, 0.0 }
 0x8cc   :  { %846 = vadd.xlane.f32.xlu0 %v845_v19 }
 0x8e2   :  { %857 = vrot.lane.b32.xlu0 %v3597_v54, %s3427_s28 }
 0x8e6   :  { %942 = vrot.lane.b32.xlu0 %v3601_v55, %s4282_s6 }
 0x951   :  { %v850_v20 = vpop.xlane.xlu0 %849 }
 0x952   :  { %3325 = vrcp.f32 %v850_v20 }
 0x955   :  { %v847_v21 = vpop.xlane.xlu0 %846 }
 0x956   :  { %3327 = vrcp.f32 %v847_v21 }
 0x959   :  { %v858_v23 = vpop.permute.xlu0 %857 }
 0x95a   :  { %3129 = vmatprep.subr.mxu1 %v858_v23 }
 0x95b   :  { %3130 = vmatpush3.msra.mxu1 %v858_v23 }
 0x95c   :  { %3131 = vmatprep.subr.mxu1 %v856_v22 }
 0x95d   :  { %3132 = vmatpush3.msra.mxu1 %v856_v22  ;;  %v943_v35 = vpop.permute.xlu0 %942 }
 0x95e   :  { %3136 = vmatprep.subr.msk.mxu1 %vm348_vm5, %v949_v28 }
 0x95f   :  { %v3326_v29 = vpop.eup %3325 }
 0x960   :  { %v854_v34 = vmul.f32 %v3326_v29, %v3322_v16 }
 0x963   :  { %v3328_v32 = vpop.eup %3327 }
 0x964   :  { %v853_v33 = vmul.f32 %v3328_v32, %v3324_v18 }
 0x966   :  { %3133 = vmatprep.mubr.msk.f32.mxu1 %vm432_vm6, %v853_v33 }
 0x967   :  { %3134 = vmatmul.mubr.msk.f32.vlgmr.msra.gmra.mxu1 %vm432_vm6, %v854_v34 }
 0x968   :  { %3137 = vmatpush3.xpose.msk.msra.mxu1 %vm348_vm5, %v949_v28  ;;  %3140 = vmatprep.mubr.msk.f32.mxu1 %vm348_vm5, %v943_v35 }
 0x969   :  { %3138 = vmatprep.subr.msk.mxu1 %vm348_vm5, %v947_v36 }
 0x96c   :  { %3139 = vmatpush3.xpose.msk.msra.mxu1 %vm348_vm5, %v947_v36 }
 0x96f   :  { %3141 = vmatmul.mubr.msk.f32.vlgmr.msra.gmra.mxu1 %vm348_vm5, %v945_v37 }
 0xa27   :  { %v3135_v38 = vpop.f32.mrf.mxu1 }
 0xa29   :  { %v933_v39 = vpop.f32.mrf.mxu1 }
 0xa2f   :  { %v3142_v40 = vpop.f32.mrf.mxu1 }
 0xa30   :  { %v1030_v41 = vadd.f32 %v3142_v40, %v3616_v58  ;;  %v3798_v40 = vld [vmem:[%s4268_s12 + $0x28] sm:$0xff] }
 0xa31   :  { %v1024_v42 = vpop.f32.mrf.mxu1 }
 0xa32   :  { %v1025_v43 = vadd.f32 %v1024_v42, %v3621_v60  ;;  %v1036_v44 = vsel %vm432_vm6, %v1030_v41, -inf  ;;  %v3434_v42 = vmov 0.0  }
 0xa33   :  { %1037 = vmax.xlane.f32.xlu1 %v1036_v44  ;;  %1370 = vmatprep.mubr.f32.mxu1 %v3434_v42  ;;  %v3817_v44 = vld [vmem:[%s4268_s12 + $0x10] sm:$0xff] }
 0xa34   :  { %v1033_v45 = vsel %vm432_vm6, %v1025_v43, -inf }
 0xa35   :  { %1034 = vmax.xlane.f32.xlu0 %v1033_v45  ;;  %v3823_v45 = vld [vmem:[%s4268_s12 + $0x8] sm:$0xff] }
 0xa44   :  { %1055 = vrot.lane.b32.xlu1 %v3601_v55, %s4280_s30 }
 0xa48   :  { %1144 = vrot.lane.b32.xlu1 %v3681_v1, %s4276_s0  ;;  %v3735_v1 = vld [vmem:[%s4263_s7 + $0x10] sm:$0xff] }
 0xa4c   :  { %1146 = vrot.lane.b32.xlu1 %v3679_v0, %s4276_s0 }
 0xa50   :  { %1154 = vrot.lane.b32.xlu1 %v3135_v38, %s4274_s17  ;;  %v3788_v38 = vld [vmem:[%s4268_s12 + $0x38] sm:$0xff] }
 0xa51   :  { %1330 = vmatprep.subr.mxu1 %v3788_v38 }
 0xabc   :  { %v1038_v58 = vpop.xlane.xlu1 %1037 }
 0xabd   :  { %v1040_v60 = vsub.f32 %v1030_v41, %v1038_v58  ;;  %v3804_v41 = vld [vmem:[%s4268_s12 + $0x20] sm:$0xff] }
 0xabe   :  { %v1035_v46 = vpop.xlane.xlu0 %1034  ;;  %v3829_v58 = vld [vmem:[%s4268_s12] sm:$0xff] }
 0xabf   :  { %v1043_v47 = vmul.f32 1.442695, %v1040_v60  ;;  %v1039_v48 = vsub.f32 %v1025_v43, %v1035_v46  ;;  %v3811_v43 = vld [vmem:[%s4268_s12 + $0x18] sm:$0xff]  ;;  %v57_v60 = vld [vmem:[%s4259_s3 + $0x8] sm:$0xff]  ;;  %v56_v46 = vld [vmem:[%s4259_s3] sm:$0xff] }
 0xac0   :  { %v1056_v59 = vpop.permute.xlu1 %1055 }
 0xac1   :  { %3329 = vpow2.f32 %v1043_v47  ;;  %v1041_v49 = vmul.f32 1.442695, %v1039_v48  ;;  %v3435_v47 = vmov 0   ;;  %v58_v48 = vld [vmem:[%s4260_s4] sm:$0xff] }
 0xac2   :  { %3296 = vset.pattern.permute.xlu1 %v3435_v47  ;;  %3295 = vset.pattern.permute.xlu0 %v3435_v47 }
 0xac3   :  { %3331 = vpow2.f32 %v1041_v49  ;;  %v59_v49 = vld [vmem:[%s4260_s4 + $0x8] sm:$0xff] }
 0xac4   :  { %v1145_v6 = vpop.permute.xlu1 %1144 }
 0xac5   :  { %v1166_v12 = vsel %vm348_vm5, %v3651_v31, %v1145_v6 }
 0xac8   :  { %v1147_v7 = vpop.permute.xlu1 %1146 }
 0xac9   :  { %v1167_v14 = vsel %vm348_vm5, %v3649_v30, %v1147_v7 }
 0xacc   :  { %v1155_v8 = vpop.permute.xlu1 %1154 }
 0xacd   :  { %v1169_v17 = vsel %vm432_vm6, %v1167_v14, %v1155_v8  ;;  %v3850_v8 = vld [vmem:[%s4266_s10] ss:$0 sm:$0xff] }
 0xace   :  { %v3330_v50 = vpop.eup %3329 }
 0xacf   :  { %v1048_v55 = vsel %vm432_vm6, %v3330_v50, 0.0 }
 0xad0   :  { %v3332_v51 = vpop.eup %3331  ;;  %1049 = vadd.xlane.f32.xlu0 %v1048_v55 }
 0xad1   :  { %v1045_v52 = vsel %vm432_vm6, %v3332_v51, 0.0 }
 0xad4   :  { %1046 = vadd.xlane.f32.xlu0 %v1045_v52 }
 0xaea   :  { %1057 = vrot.lane.b32.xlu0 %v3597_v54, %s4280_s30  ;;  %v3730_v54 = vld [vmem:[%s4263_s7 + $0x18] sm:$0xff] }
 0xaee   :  { %1152 = vrot.lane.b32.xlu0 %v933_v39, %s4274_s17  ;;  %v3793_v39 = vld [vmem:[%s4268_s12 + $0x30] sm:$0xff] }
 0xaef   :  { %1331 = vmatpush1.msra.mxu1 %v3793_v39 }
 0xaf0   :  { %1332 = vmatprep.subr.mxu1 %v3798_v40 }
 0xaf1   :  { %1333 = vmatpush1.msra.mxu1 %v3804_v41 }
 0xaf2   :  { %1334 = vmatprep.subr.mxu1 %v3811_v43 }
 0xaf3   :  { %1335 = vmatpush1.msra.mxu1 %v3817_v44 }
 0xaf4   :  { %1336 = vmatprep.subr.mxu1 %v3823_v45 }
 0xaf5   :  { %1337 = vmatpush1.msra.mxu1 %v3829_v58 }
 0xaf6   :  { %3180 = vmatprep.subr.mxu1 %v3564_v24 }
 0xb59   :  { %v1050_v53 = vpop.xlane.xlu0 %1049 }
 0xb5a   :  { %3333 = vrcp.f32 %v1050_v53 }
 0xb5d   :  { %v1047_v56 = vpop.xlane.xlu0 %1046 }
 0xb5e   :  { %3335 = vrcp.f32 %v1047_v56 }
 0xb61   :  { %v1058_v57 = vpop.permute.xlu0 %1057 }
 0xb62   :  { %3143 = vmatprep.subr.mxu0 %v1058_v57 }
 0xb63   :  { %3144 = vmatpush3.msra.mxu0 %v1058_v57 }
 0xb64   :  { %3145 = vmatprep.subr.mxu0 %v1056_v59 }
 0xb65   :  { %3146 = vmatpush3.msra.mxu0 %v1056_v59  ;;  %v1153_v9 = vpop.permute.xlu0 %1152 }
 0xb66   :  { %3150 = vmatprep.subr.mxu0 %v3730_v54  ;;  %v1168_v15 = vsel %vm432_vm6, %v1166_v12, %v1153_v9 }
 0xb67   :  { %v3334_v61 = vpop.eup %3333 }
 0xb68   :  { %v1054_v0 = vmul.f32 %v3334_v61, %v3330_v50 }
 0xb6b   :  { %v3336_v62 = vpop.eup %3335 }
 0xb6c   :  { %v1053_v63 = vmul.f32 %v3336_v62, %v3332_v51 }
 0xb6e   :  { %3147 = vmatprep.mubr.msk.f32.mxu0 %vm432_vm6, %v1053_v63 }
 0xb6f   :  { %3148 = vmatmul.mubr.msk.f32.vlgmr.msra.gmra.mxu0 %vm432_vm6, %v1054_v0 }
 0xb70   :  { %3151 = vmatpush3.msra.mxu0 %v3730_v54 }
 0xb71   :  { %3152 = vmatprep.subr.mxu0 %v3735_v1 }
 0xb72   :  { %3153 = vmatpush3.msra.mxu0 %v3735_v1 }
 0xb73   :  { %3154 = vmatprep.subr.mxu0 %v3744_v2 }
 0xb74   :  { %3155 = vmatpush3.msra.mxu0 %v3744_v2 }
 0xb75   :  { %3156 = vmatprep.subr.mxu0 %v3751_v3 }
 0xb76   :  { %3157 = vmatpush3.msra.mxu0 %v3751_v3 }
 0xc2f   :  { %v3149_v4 = vpop.f32.mrf.mxu0 }
 0xc30   :  { %1162 = vrot.lane.b32.xlu1 %v3149_v4, %s4278_s21 }
 0xc31   :  { %v1133_v5 = vpop.f32.mrf.mxu0 }
 0xc32   :  { %1160 = vrot.lane.b32.xlu0 %v1133_v5, %s4278_s21 }
 0xca2   :  { %v1163_v13 = vpop.permute.xlu1 %1162 }
 0xca3   :  { %v1172_v19 = vsel %vm1170_vm7, %v1169_v17, %v1163_v13  ;;  %v3856_v13 = vld [vmem:[%s4267_s11] ss:$0 sm:$0xff] }
 0xca4   :  { %v1161_v16 = vpop.permute.xlu0 %1160 }
 0xca5   :  { %v1171_v18 = vsel %vm1170_vm7, %v1168_v15, %v1161_v16 }
 0xca6   :  { %3158 = vmatprep.mubr.msk.f32.mxu0 %vm134_vm0, %v1171_v18 }
 0xca7   :  { %3159 = vmatmul.mubr.msk.f32.vlgmr.msra.gmra.mxu0 %vm134_vm0, %v1172_v19 }
 0xd67   :  { %v3160_v20 = vpop.f32.mrf.mxu0 }
 0xd68   :  { %v3768_v31 = vadd.f32 %v3160_v20, %v3551_v11  ;;  %v3880_v20 = vld [vmem:[%s4270_s14 + $0x30] sm:$0xff] }
 0xd69   :  { %v1245_v21 = vpop.f32.mrf.mxu0 }
 0xd6a   :  { %v3771_v30 = vadd.f32 %v1245_v21, %v3549_v10  ;;  %v1259_v22 = vsel %vm134_vm0, %v3768_v31, 0.0  ;;  %v3910_v21 = vld [vmem:[%s4270_s14 + $0x10] sm:$0xff] }
 0xd6b   :  { %1260 = vadd.xlane.f32.xlu1 %v1259_v22  ;;  %v3917_v22 = vld [vmem:[%s4270_s14 + $0x8] sm:$0xff] }
 0xd6c   :  { %v1256_v23 = vsel %vm134_vm0, %v3771_v30, 0.0 }
 0xd6d   :  { %1257 = vadd.xlane.f32.xlu0 %v1256_v23  ;;  %v3924_v23 = vld [vmem:[%s4270_s14] sm:$0xff] }
 0xd7c   :  { %1397 = vperm.xlu1 %3296, %v57_v60  }
 0xd80   :  { %1421 = vperm.xlu1 %3296, %v58_v48  }
 0xd84   :  { %1426 = vperm.xlu1 %3296, %v59_v49  }
 0xdf4   :  { %v1261_v28 = vpop.xlane.xlu1 %1260 }
 0xdf5   :  { %v1263_v29 = vmul.f32 0.03125, %v1261_v28  ;;  %v1385_v28 = vlaneseq }
 0xdf6   :  { %v1258_v32 = vpop.xlane.xlu0 %1257 }
 0xdf7   :  { %v1262_v33 = vmul.f32 0.03125, %v1258_v32  ;;  %v3778_v34 = vsub.f32 %v3768_v31, %v1263_v29  ;;  %v3928_v32 = vshrl.u32 %v1385_v28, 7 }
 0xdf9   :  { %v1264_v11 = vsub.f32 %v3771_v30, %v1262_v33  ;;  %v1267_v36 = vmul.f32 %v3778_v34, %v3778_v34  ;;  %v1295_v15 = vmul.f32 %v3850_v8, %v3778_v34  ;;  %vm1387_vm12 = vcmp.lt.s32.totalorder %v3928_v32, 1 }
 0xdfa   :  { %vm1416_vm13 = vcmp.lt.s32.totalorder %v3928_v32, 7 }
 0xdfb   :  { %v1266_v35 = vmul.f32 %v1264_v11, %v1264_v11  ;;  %v1271_v37 = vsel %vm134_vm0, %v1267_v36, 0.0  ;;  %v1294_v9 = vmul.f32 %v3850_v8, %v1264_v11 }
 0xdfd   :  { %v1268_v10 = vsel %vm134_vm0, %v1266_v35, 0.0 }
 0xdfe   :  { %1269 = vadd.xlane.f32.xlu0 %v1268_v10 }
 0xe02   :  { %1272 = vadd.xlane.f32.xlu0 %v1271_v37  ;;  %v3937_v37 = vpop.permute.xlu1 %1397 }
 0xe06   :  { %v3939_v60 = vpop.permute.xlu1 %1421 }
 0xe18   :  { %1392 = vperm.xlu0 %3295, %v56_v46  }
 0xe87   :  { %v1270_v50 = vpop.xlane.xlu0 %1269 }
 0xe88   :  { %v1274_v55 = vmul.f32 0.032258064, %v1270_v50 }
 0xe8a   :  { %3337 = vrsqrt.f32 %v1274_v55  ;;  %vm1278_vm8 = vcmp.eq.f32.partialorder %v1274_v55, inf  ;;  %v1281_v57 = vand.u32 2147483648, %v1274_v55  ;;  %vm1280_vm9 = vcmp.eq.f32.partialorder %v1274_v55, 0.0 }
 0xe8b   :  { %v1273_v51 = vpop.xlane.xlu0 %1272 }
 0xe8c   :  { %v1275_v52 = vmul.f32 0.032258064, %v1273_v51  ;;  %v3950_v51 = vld [vmem:[%s4269_s13] ss:$0 sm:$0xff] }
 0xe8e   :  { %3339 = vrsqrt.f32 %v1275_v52  ;;  %vm1285_vm10 = vcmp.eq.f32.partialorder %v1275_v52, inf  ;;  %v1288_v4 = vand.u32 2147483648, %v1275_v52  ;;  %vm1287_vm11 = vcmp.eq.f32.partialorder %v1275_v52, 0.0 }
 0xe93   :  { %v3941_v47 = vpop.permute.xlu0 %1392 }
 0xe97   :  { %v3338_v53 = vpop.eup %3337 }
 0xe98   :  { %v1277_v56 = vmul.f32 %v3338_v53, %v1274_v55 }
 0xe9a   :  { %v1279_v59 = vsel %vm1278_vm8, %v1274_v55, %v1277_v56  ;;  %v3945_v55 = vpop.permute.xlu1 %1426 }
 0xe9b   :  { %v3340_v61 = vpop.eup %3339  ;;  %v1282_v62 = vsel %vm1280_vm9, %v1281_v57, %v1279_v59 }
 0xe9c   :  { %v1290_v63 = vadd.f32 1e-06, %v1282_v62  ;;  %v1284_v0 = vmul.f32 %v3340_v61, %v1275_v52 }
 0xe9e   :  { %3341 = vrcp.f32 %v1290_v63  ;;  %v1286_v5 = vsel %vm1285_vm10, %v1275_v52, %v1284_v0 }
 0xe9f   :  { %v1289_v6 = vsel %vm1287_vm11, %v1288_v4, %v1286_v5 }
 0xea0   :  { %v1291_v7 = vadd.f32 1e-06, %v1289_v6 }
 0xea2   :  { %3343 = vrcp.f32 %v1291_v7 }
 0xeab   :  { %v3342_v12 = vpop.eup %3341 }
 0xeac   :  { %v1296_v14 = vmul.f32 %v3342_v12, %v1294_v9 }
 0xeae   :  { %v1298_v16 = vadd.f32 %v3856_v13, %v1296_v14 }
 0xeaf   :  { %v3344_v17 = vpop.eup %3343 }
 0xeb0   :  { %2920 = vmatmul.mubr.msk.f32.vlgmr.msra.gmra.mxu1 %vm134_vm0, %v1298_v16  ;;  %v1297_v18 = vmul.f32 %v3344_v17, %v1295_v15 }
 0xeb1   :  { %1376 = vmatprep.mubr.f32.mxu1 %v3434_v42  ;;  %3181 = vmatpush3.msra.mxu1 %v3564_v24  ;;  %v3875_v24 = vld [vmem:[%s4270_s14 + $0x38] sm:$0xff] }
 0xeb2   :  { %v1299_v19 = vadd.f32 %v3856_v13, %v1297_v18  ;;  %3182 = vmatprep.subr.mxu1 %v3569_v25  ;;  %3161 = vmatprep.subr.mxu0 %v3875_v24 }
 0xeb3   :  { %3183 = vmatpush3.msra.mxu1 %v3569_v25  ;;  %3162 = vmatpush3.msra.mxu0 %v3875_v24  ;;  %v3887_v25 = vld [vmem:[%s4270_s14 + $0x28] sm:$0xff] }
 0xeb4   :  { %2921 = vmatmul.mubr.msk.f32.gmra.mxu1 %vm134_vm0, %v1299_v19  ;;  %3184 = vmatprep.subr.mxu1 %v3576_v26 }
 0xeb5   :  { %3185 = vmatpush3.msra.mxu1 %v3576_v26  ;;  %3163 = vmatprep.subr.mxu0 %v3880_v20  ;;  %v3896_v26 = vld [vmem:[%s4270_s14 + $0x20] sm:$0xff] }
 0xeb6   :  { %3186 = vmatprep.subr.mxu1 %v3585_v27  ;;  %3164 = vmatpush3.msra.mxu0 %v3880_v20 }
 0xeb7   :  { %3187 = vmatpush3.msra.mxu1 %v3585_v27  ;;  %3165 = vmatprep.subr.mxu0 %v3887_v25  ;;  %v3903_v27 = vld [vmem:[%s4270_s14 + $0x18] sm:$0xff] }
 0xeb8   :  { %3166 = vmatpush3.msra.mxu0 %v3887_v25 }
 0xeb9   :  { %3167 = vmatprep.subr.mxu0 %v3896_v26 }
 0xeba   :  { %3168 = vmatpush3.msra.mxu0 %v3896_v26 }
 0xebb   :  { %3169 = vmatprep.subr.mxu0 %v3903_v27 }
 0xebc   :  { %3170 = vmatpush3.msra.mxu0 %v3903_v27 }
 0xebd   :  { %3171 = vmatprep.subr.mxu0 %v3910_v21 }
 0xebe   :  { %3172 = vmatpush3.msra.mxu0 %v3910_v21 }
 0xebf   :  { %3173 = vmatprep.subr.mxu0 %v3917_v22 }
 0xec0   :  { %3174 = vmatpush3.msra.mxu0 %v3917_v22 }
 0xec1   :  { %3175 = vmatprep.subr.mxu0 %v3924_v23 }
 0xec2   :  { %3176 = vmatpush3.msra.mxu0 %v3924_v23 }
 0xf70   :  { %v1372_v29 = vpop.f32.mrf.mxu1 }
 0xf71   :  { %1406 = vrot.lane.b32.xlu1 %v1372_v29, %s3421_s5  ;;  %v1383_v11 = vrot.slane %v1372_v29, 7 }
 0xf72   :  { %v1374_v33 = vpop.f32.mrf.mxu1 }
 0xf73   :  { %v1414_v50 = vrot.slane %v1374_v33, 1  ;;  %v3975_v33 = vld [vmem:[%s4271_s15] ss:$0 sm:$0xff] }
 0xf74   :  { %v1378_v34 = vpop.f32.mrf.mxu1 }
 0xf75   :  { %v1384_v35 = vrot.slane %v1378_v34, 7  ;;  %1408 = vrot.lane.b32.xlu1 %v1378_v34, %s3421_s5 }
 0xf76   :  { %v1380_v46 = vpop.f32.mrf.mxu1 }
 0xf77   :  { %v1389_v10 = vsel %vm1387_vm12, %v1384_v35, %v1383_v11  ;;  %v1388_v36 = vsel %vm1387_vm12, %v1383_v11, %v1384_v35  ;;  %v1415_v48 = vrot.slane %v1380_v46, 1 }
 0xf78   :  { %v1400_v49 = vmul.f32 %v3941_v47, %v1389_v10  ;;  %v1401_v56 = vmul.f32 %v3937_v37, %v1388_v36 }
 0xf79   :  { %v1417_v52 = vsel %vm1416_vm13, %v1414_v50, %v1415_v48  ;;  %v1418_v62 = vsel %vm1416_vm13, %v1415_v48, %v1414_v50 }
 0xf7a   :  { %v1402_v53 = vadd.f32 %v3950_v51, %v1400_v49  ;;  %v1429_v61 = vmul.f32 %v3939_v60, %v1417_v52  ;;  %v1403_v0 = vadd.f32 %v3950_v51, %v1401_v56  ;;  %v1430_v7 = vmul.f32 %v3945_v55, %v1418_v62 }
 0xfe3   :  { %v1407_v57 = vpop.permute.xlu1 %1406 }
 0xfe4   :  { %v1412_v59 = vadd.f32 %v1407_v57, %v1402_v53 }
 0xfe6   :  { %v1431_v63 = vadd.f32 %v1429_v61, %v1412_v59 }
 0xfe7   :  { %v1409_v4 = vpop.permute.xlu1 %1408 }
 0xfe8   :  { %v1433_v5 = vmax.f32 %v1431_v63, 0.0  ;;  %v1413_v6 = vadd.f32 %v1409_v4, %v1403_v0  ;;  %v2925_v4 = vld [vmem:[%s4257_s1 + $0x18] sm:$0xff] }
 0xfea   :  { %v1432_v9 = vadd.f32 %v1430_v7, %v1413_v6  ;;  %3177 = vmatprep.mubr.msk.f32.mxu0 %vm1435_vm14, %v1433_v5  ;;  %v2924_v6 = vld [vmem:[%s4257_s1 + $0x10] sm:$0xff] }
 0xfec   :  { %v1434_v12 = vmax.f32 %v1432_v9, 0.0 }
 0xfee   :  { %3178 = vmatmul.mubr.msk.f32.vlgmr.msra.gmra.mxu0 %vm1435_vm14, %v1434_v12 }
0x10ae   :  { %v3179_v14 = vpop.f32.mrf.mxu0 }
0x10af   :  { %1529 = vrot.lane.b32.xlu0 %v3179_v14, %s3420_s18  ;;  %1537 = vrot.lane.b32.xlu1 %v3179_v14, %s3421_s5  ;;  %v1518_v17 = vrot.slane %v3179_v14, 7 }
0x10b0   :  { %v1508_v15 = vpop.f32.mrf.mxu0 }
0x10b1   :  { %v1517_v16 = vrot.slane %v1508_v15, 7 }
0x10b3   :  { %1535 = vrot.lane.b32.xlu1 %v1508_v15, %s3421_s5  ;;  %v1519_v18 = vsel %vm1387_vm12, %v1517_v16, %v1518_v17  ;;  %v1520_v28 = vsel %vm1387_vm12, %v1518_v17, %v1517_v16 }
0x10b4   :  { %v1522_v29 = vmul.f32 %v1519_v18, %v3937_v37  ;;  %v1521_v34 = vmul.f32 %v1520_v28, %v3941_v47 }
0x10b6   :  { %v1524_v46 = vadd.f32 %v3975_v33, %v1522_v29  ;;  %v1523_v50 = vadd.f32 %v3975_v33, %v1521_v34 }
0x10b7   :  { %1527 = vrot.lane.b32.xlu1 %v1508_v15, %s3420_s18 }
0x1121   :  { %v1538_v19 = vpop.permute.xlu1 %1537  ;;  %v1530_v35 = vpop.permute.xlu0 %1529 }
0x1122   :  { %v1542_v10 = vrot.slane %v1538_v19, 1  ;;  %v1534_v52 = vadd.f32 %v1530_v35, %v1524_v46 }
0x1125   :  { %v1536_v11 = vpop.permute.xlu1 %1535 }
0x1126   :  { %v1541_v36 = vrot.slane %v1536_v11, 1 }
0x1128   :  { %v1543_v48 = vsel %vm1416_vm13, %v1541_v36, %v1542_v10  ;;  %v1544_v49 = vsel %vm1416_vm13, %v1542_v10, %v1541_v36 }
0x1129   :  { %v1546_v53 = vmul.f32 %v1544_v49, %v3945_v55  ;;  %v1545_v56 = vmul.f32 %v1543_v48, %v3939_v60  ;;  %v1528_v57 = vpop.permute.xlu1 %1527 }
0x112a   :  { %v1533_v59 = vadd.f32 %v1528_v57, %v1523_v50 }
0x112b   :  { %v1548_v61 = vadd.f32 %v1546_v53, %v1534_v52 }
0x112c   :  { %v1547_v62 = vadd.f32 %v1545_v56, %v1533_v59 }
0x112d   :  { %v1550_v63 = vmax.f32 %v1548_v61, 0.0 }
0x112e   :  { %v1549_v0 = vmax.f32 %v1547_v62, 0.0 }
0x112f   :  { %v1552_v5 = vadd.f32 %v1550_v63, %v3768_v31 }
0x1130   :  { %v1551_v7 = vadd.f32 %v1549_v0, %v3771_v30 }
0x1131   :  { %v3994_v9 = vadd.f32 %v2925_v4, %v1552_v5  ;;  %v3393_v4 = vld [vmem:[%s4264_s8] ss:$0 sm:$0xff] }
0x1132   :  { %v3996_v12 = vadd.f32 %v2924_v6, %v1551_v7 }
0x1133   :  { %v1561_v14 = vsel %vm134_vm0, %v3994_v9, 0.0 }
0x1134   :  { %1562 = vadd.xlane.f32.xlu0 %v1561_v14  ;;  %v1558_v15 = vsel %vm134_vm0, %v3996_v12, 0.0 }
0x1135   :  { %1559 = vadd.xlane.f32.xlu1 %v1558_v15 }
0x11bd   :  { %v1563_v16 = vpop.xlane.xlu0 %1562 }
0x11be   :  { %v1565_v31 = vmul.f32 0.03125, %v1563_v16  ;;  %v1560_v17 = vpop.xlane.xlu1 %1559 }
0x11bf   :  { %v1564_v18 = vmul.f32 0.03125, %v1560_v17 }
0x11c0   :  { %v1567_v19 = vsub.f32 %v3994_v9, %v1565_v31  ;;  %v3394_v31 = vld [vmem:[%s4265_s9] ss:$0 sm:$0xff] }
0x11c1   :  { %v1566_v30 = vsub.f32 %v3996_v12, %v1564_v18 }
0x11c2   :  { %v1569_v28 = vmul.f32 %v1567_v19, %v1567_v19  ;;  %v1597_v5 = vmul.f32 %v3393_v4, %v1567_v19 }
0x11c3   :  { %v1568_v29 = vmul.f32 %v1566_v30, %v1566_v30  ;;  %v1596_v7 = vmul.f32 %v3393_v4, %v1566_v30 }
0x11c4   :  { %v1573_v34 = vsel %vm134_vm0, %v1569_v28, 0.0 }
0x11c5   :  { %1574 = vadd.xlane.f32.xlu1 %v1573_v34  ;;  %v1570_v11 = vsel %vm134_vm0, %v1568_v29, 0.0 }
0x11c6   :  { %1571 = vadd.xlane.f32.xlu0 %v1570_v11 }
0x124e   :  { %v1575_v35 = vpop.xlane.xlu1 %1574 }
0x124f   :  { %v1577_v10 = vmul.f32 0.032258064, %v1575_v35  ;;  %v1572_v36 = vpop.xlane.xlu0 %1571 }
0x1250   :  { %v1576_v46 = vmul.f32 0.032258064, %v1572_v36 }
0x1251   :  { %3345 = vrsqrt.f32 %v1577_v10  ;;  %vm1587_vm15 = vcmp.eq.f32.partialorder %v1577_v10, inf  ;;  %v1590_v52 = vand.u32 2147483648, %v1577_v10  ;;  %vm1589_vm1 = vcmp.eq.f32.partialorder %v1577_v10, 0.0 }
0x1252   :  { %3347 = vrsqrt.f32 %v1576_v46  ;;  %vm1580_vm2 = vcmp.eq.f32.partialorder %v1576_v46, inf  ;;  %v1583_v57 = vand.u32 2147483648, %v1576_v46  ;;  %vm1582_vm3 = vcmp.eq.f32.partialorder %v1576_v46, 0.0 }
0x125e   :  { %v3346_v48 = vpop.eup %3345 }
0x125f   :  { %v3348_v49 = vpop.eup %3347  ;;  %v1586_v50 = vmul.f32 %v3346_v48, %v1577_v10 }
0x1260   :  { %v1579_v53 = vmul.f32 %v3348_v49, %v1576_v46 }
0x1261   :  { %v1588_v56 = vsel %vm1587_vm15, %v1577_v10, %v1586_v50  ;;  %v4053_v50 = vld [vmem:[%s4258_s2] sm:$0xff] }
0x1262   :  { %v1591_v59 = vsel %vm1589_vm1, %v1590_v52, %v1588_v56  ;;  %v1581_v61 = vsel %vm1580_vm2, %v1576_v46, %v1579_v53  ;;  %v4047_v46 = vld [vmem:[%s4258_s2 + $0x8] sm:$0xff]  ;;  %s4286_s2 = smov 104  }
0x1263   :  { %v1593_v62 = vadd.f32 1e-06, %v1591_v59  ;;  %v1584_v63 = vsel %vm1582_vm3, %v1583_v57, %v1581_v61 }
0x1264   :  { %v1592_v0 = vadd.f32 1e-06, %v1584_v63 }
0x1265   :  { %3349 = vrcp.f32 %v1593_v62 }
0x1266   :  { %3351 = vrcp.f32 %v1592_v0 }
0x1272   :  { %v3350_v6 = vpop.eup %3349 }
0x1273   :  { %v3352_v14 = vpop.eup %3351  ;;  %v1599_v15 = vmul.f32 %v3350_v6, %v1597_v5 }
0x1274   :  { %v1598_v16 = vmul.f32 %v3352_v14, %v1596_v7 }
0x1275   :  { %v1601_v18 = vadd.f32 %v3394_v31, %v1599_v15 }
0x1276   :  { %v1600_v17 = vadd.f32 %v3394_v31, %v1598_v16 }
0x1278   :  { %3188 = vmatprep.mubr.msk.f32.mxu1 %vm134_vm0, %v1600_v17 }
0x1279   :  { %3189 = vmatmul.mubr.msk.f32.vlgmr.msra.gmra.mxu1 %vm134_vm0, %v1601_v18 }
0x1339   :  { %v4014_v28 = vpop.f32.mrf.mxu1 }
0x133a   :  { %1687 = vrot.lane.b32.xlu0 %v4014_v28, %s3420_s18 }
0x133b   :  { %v4018_v19 = vpop.f32.mrf.mxu1 }
0x133c   :  { %1685 = vrot.lane.b32.xlu1 %v4018_v19, %s3420_s18  ;;  %3195 = vmatprep.mubr.msk.f32.mxu1 %vm348_vm5, %v4018_v19 }
0x133e   :  { %1885 = vrot.lane.b32.xlu0 %v4018_v19, %s3422_s23 }
0x1340   :  { %1887 = vrot.lane.b32.xlu1 %v4014_v28, %s3422_s23 }
0x1342   :  { %1883 = vrot.lane.b32.xlu0 %v4014_v28, %s3423_s24 }
0x1344   :  { %1881 = vrot.lane.b32.xlu1 %v4018_v19, %s3423_s24 }
0x13ac   :  { %v1688_v30 = vpop.permute.xlu0 %1687 }
0x13ad   :  { %3191 = vmatprep.subr.msk.mxu1 %vm348_vm5, %v1688_v30 }
0x13ae   :  { %3192 = vmatpush3.xpose.msk.msra.mxu1 %vm348_vm5, %v1688_v30  ;;  %v1686_v29 = vpop.permute.xlu1 %1685 }
0x13af   :  { %3193 = vmatprep.subr.msk.mxu1 %vm348_vm5, %v1686_v29 }
0x13b0   :  { %v1886_v11 = vpop.permute.xlu0 %1885 }
0x13b2   :  { %3194 = vmatpush3.xpose.msk.msra.mxu1 %vm348_vm5, %v1686_v29  ;;  %v1888_v34 = vpop.permute.xlu1 %1887 }
0x13b3   :  { %3205 = vmatprep.subr.msk.mxu1 %vm348_vm5, %v1888_v34 }
0x13b4   :  { %v1884_v10 = vpop.permute.xlu0 %1883 }
0x13b5   :  { %3196 = vmatmul.mubr.msk.f32.vlgmr.msra.gmra.mxu1 %vm348_vm5, %v4014_v28 }
0x13b6   :  { %v1882_v35 = vpop.permute.xlu1 %1881  ;;  %3206 = vmatpush3.xpose.msk.msra.mxu1 %vm348_vm5, %v1888_v34 }
0x13b7   :  { %3207 = vmatprep.subr.msk.mxu1 %vm348_vm5, %v1886_v11  ;;  %3209 = vmatprep.mubr.msk.f32.mxu1 %vm348_vm5, %v1882_v35 }
0x13ba   :  { %3208 = vmatpush3.xpose.msk.msra.mxu1 %vm348_vm5, %v1886_v11 }
0x13bd   :  { %3210 = vmatmul.mubr.msk.f32.vlgmr.msra.gmra.mxu1 %vm348_vm5, %v1884_v10 }
0x1475   :  { %v3197_v36 = vpop.f32.mrf.mxu1 }
0x1476   :  { %v1769_v48 = vadd.f32 %v4047_v46, %v3197_v36 }
0x1477   :  { %v1763_v49 = vpop.f32.mrf.mxu1 }
0x1478   :  { %v1764_v52 = vadd.f32 %v4053_v50, %v1763_v49  ;;  %v1775_v53 = vsel %vm432_vm6, %v1769_v48, -inf }
0x1479   :  { %1776 = vmax.xlane.f32.xlu0 %v1775_v53 }
0x147a   :  { %v1772_v56 = vsel %vm432_vm6, %v1764_v52, -inf }
0x147b   :  { %1773 = vmax.xlane.f32.xlu1 %v1772_v56 }
0x147d   :  { %v3211_v57 = vpop.f32.mrf.mxu1 }
0x147e   :  { %v1969_v59 = vadd.f32 %v4047_v46, %v3211_v57 }
0x147f   :  { %v1963_v61 = vpop.f32.mrf.mxu1 }
0x1480   :  { %v1964_v62 = vadd.f32 %v4053_v50, %v1963_v61  ;;  %v1975_v63 = vsel %vm432_vm6, %v1969_v59, -inf }
0x1481   :  { %1976 = vmax.xlane.f32.xlu1 %v1975_v63 }
0x1482   :  { %v1972_v0 = vsel %vm432_vm6, %v1964_v62, -inf }
0x1483   :  { %1973 = vmax.xlane.f32.xlu0 %v1972_v0 }
0x1492   :  { %1794 = vrot.lane.b32.xlu1 %v4018_v19, %s3421_s5 }
0x1496   :  { %1996 = vrot.lane.b32.xlu1 %v4014_v28, %s3424_s25 }
0x1499   :  { %1796 = vrot.lane.b32.xlu0 %v4014_v28, %s3421_s5 }
0x1502   :  { %v1777_v4 = vpop.xlane.xlu0 %1776 }
0x1503   :  { %v1779_v5 = vsub.f32 %v1769_v48, %v1777_v4 }
0x1504   :  { %v1774_v6 = vpop.xlane.xlu1 %1773 }
0x1505   :  { %v1782_v7 = vmul.f32 1.442695, %v1779_v5  ;;  %v1778_v14 = vsub.f32 %v1764_v52, %v1774_v6 }
0x1507   :  { %3353 = vpow2.f32 %v1782_v7  ;;  %v1780_v15 = vmul.f32 1.442695, %v1778_v14 }
0x1509   :  { %3355 = vpow2.f32 %v1780_v15 }
0x150a   :  { %v1977_v16 = vpop.xlane.xlu1 %1976 }
0x150b   :  { %v1979_v31 = vsub.f32 %v1969_v59, %v1977_v16 }
0x150c   :  { %v1974_v17 = vpop.xlane.xlu0 %1973 }
0x150d   :  { %v1982_v18 = vmul.f32 1.442695, %v1979_v31  ;;  %v1978_v30 = vsub.f32 %v1964_v62, %v1974_v17 }
0x150e   :  { %v1795_v29 = vpop.permute.xlu1 %1794 }
0x150f   :  { %3357 = vpow2.f32 %v1982_v18  ;;  %v1980_v34 = vmul.f32 1.442695, %v1978_v30 }
0x1510   :  { %v1797_v11 = vpop.permute.xlu0 %1796 }
0x1511   :  { %3359 = vpow2.f32 %v1980_v34  ;;  %3198 = vmatprep.subr.mxu0 %v1797_v11 }
0x1512   :  { %3199 = vmatpush3.msra.mxu0 %v1797_v11  ;;  %v1997_v10 = vpop.permute.xlu1 %1996 }
0x1513   :  { %3200 = vmatprep.subr.mxu0 %v1795_v29 }
0x1514   :  { %v3354_v35 = vpop.eup %3353  ;;  %3201 = vmatpush3.msra.mxu0 %v1795_v29 }
0x1515   :  { %3212 = vmatprep.subr.mxu0 %v1997_v10  ;;  %v1787_v36 = vsel %vm432_vm6, %v3354_v35, 0.0 }
0x1516   :  { %v3356_v48 = vpop.eup %3355  ;;  %1788 = vadd.xlane.f32.xlu1 %v1787_v36 }
0x1517   :  { %v1784_v49 = vsel %vm432_vm6, %v3356_v48, 0.0 }
0x1518   :  { %1785 = vadd.xlane.f32.xlu0 %v1784_v49 }
0x151c   :  { %v3358_v52 = vpop.eup %3357 }
0x151d   :  { %v1987_v53 = vsel %vm432_vm6, %v3358_v52, 0.0 }
0x151e   :  { %v3360_v56 = vpop.eup %3359  ;;  %1988 = vadd.xlane.f32.xlu1 %v1987_v53 }
0x151f   :  { %v1984_v57 = vsel %vm432_vm6, %v3360_v56, 0.0 }
0x1520   :  { %1985 = vadd.xlane.f32.xlu0 %v1984_v57 }
0x152f   :  { %2087 = vrot.lane.b32.xlu1 %v4014_v28, %s3425_s26 }
0x1533   :  { %2081 = vrot.lane.b32.xlu1 %v4018_v19, %s3426_s27 }
0x1536   :  { %1994 = vrot.lane.b32.xlu0 %v4018_v19, %s3424_s25  ;;  %s4287_s25 = smov 40  }
0x153a   :  { %2085 = vrot.lane.b32.xlu0 %v4018_v19, %s3425_s26  ;;  %s4288_s26 = smov 8  }
0x153e   :  { %2083 = vrot.lane.b32.xlu0 %v4014_v28, %s3426_s27  ;;  %s4289_s27 = smov 16  }
0x159f   :  { %v1789_v59 = vpop.xlane.xlu1 %1788 }
0x15a0   :  { %3361 = vrcp.f32 %v1789_v59 }
0x15a1   :  { %v1786_v61 = vpop.xlane.xlu0 %1785 }
0x15a2   :  { %3363 = vrcp.f32 %v1786_v61 }
0x15a7   :  { %v1989_v62 = vpop.xlane.xlu1 %1988 }
0x15a8   :  { %3365 = vrcp.f32 %v1989_v62 }
0x15a9   :  { %v1986_v63 = vpop.xlane.xlu0 %1985 }
0x15aa   :  { %3367 = vrcp.f32 %v1986_v63 }
0x15ab   :  { %v2088_v14 = vpop.permute.xlu1 %2087 }
0x15ad   :  { %v3362_v0 = vpop.eup %3361  ;;  %v1995_v7 = vpop.permute.xlu0 %1994 }
0x15ae   :  { %v1793_v6 = vmul.f32 %v3362_v0, %v3354_v35 }
0x15af   :  { %v3364_v4 = vpop.eup %3363  ;;  %v2082_v18 = vpop.permute.xlu1 %2081 }
0x15b0   :  { %v1792_v5 = vmul.f32 %v3364_v4, %v3356_v48 }
0x15b1   :  { %v2086_v30 = vpop.permute.xlu0 %2085 }
0x15b2   :  { %3202 = vmatprep.mubr.msk.f32.mxu0 %vm432_vm6, %v1792_v5 }
0x15b3   :  { %3203 = vmatmul.mubr.msk.f32.vlgmr.msra.gmra.mxu0 %vm432_vm6, %v1793_v6 }
0x15b4   :  { %3213 = vmatpush3.msra.mxu0 %v1997_v10 }
0x15b5   :  { %3214 = vmatprep.subr.mxu0 %v1995_v7  ;;  %v3366_v15 = vpop.eup %3365  ;;  %v2084_v29 = vpop.permute.xlu0 %2083 }
0x15b6   :  { %3215 = vmatpush3.msra.mxu0 %v1995_v7  ;;  %v1993_v17 = vmul.f32 %v3366_v15, %v3358_v52 }
0x15b7   :  { %v3368_v16 = vpop.eup %3367  ;;  %3219 = vmatprep.subr.msk.mxu0 %vm348_vm5, %v2088_v14 }
0x15b8   :  { %v1992_v31 = vmul.f32 %v3368_v16, %v3360_v56 }
0x15ba   :  { %3216 = vmatprep.mubr.msk.f32.mxu0 %vm432_vm6, %v1992_v31 }
0x15bb   :  { %3217 = vmatmul.mubr.msk.f32.vlgmr.msra.gmra.mxu0 %vm432_vm6, %v1993_v17 }
0x15bc   :  { %3220 = vmatpush3.xpose.msk.msra.mxu0 %vm348_vm5, %v2088_v14  ;;  %3223 = vmatprep.mubr.msk.f32.mxu0 %vm348_vm5, %v2082_v18 }
0x15bd   :  { %3221 = vmatprep.subr.msk.mxu0 %vm348_vm5, %v2086_v30 }
0x15c0   :  { %3222 = vmatpush3.xpose.msk.msra.mxu0 %vm348_vm5, %v2086_v30 }
0x15c3   :  { %3224 = vmatmul.mubr.msk.f32.vlgmr.msra.gmra.mxu0 %vm348_vm5, %v2084_v29 }
0x1673   :  { %v4092_v34 = vpop.f32.mrf.mxu0 }
0x1675   :  { %v4094_v11 = vpop.f32.mrf.mxu0 }
0x167b   :  { %v4096_v35 = vpop.f32.mrf.mxu0 }
0x167d   :  { %v4098_v10 = vpop.f32.mrf.mxu0 }
0x1683   :  { %v3225_v36 = vpop.f32.mrf.mxu0 }
0x1684   :  { %v2169_v48 = vadd.f32 %v4047_v46, %v3225_v36 }
0x1685   :  { %v2163_v49 = vpop.f32.mrf.mxu0 }
0x1686   :  { %v2164_v52 = vadd.f32 %v4053_v50, %v2163_v49  ;;  %v2175_v53 = vsel %vm432_vm6, %v2169_v48, -inf }
0x1687   :  { %2176 = vmax.xlane.f32.xlu0 %v2175_v53 }
0x1688   :  { %v2172_v56 = vsel %vm432_vm6, %v2164_v52, -inf }
0x1689   :  { %2173 = vmax.xlane.f32.xlu1 %v2172_v56 }
0x1710   :  { %v2177_v57 = vpop.xlane.xlu0 %2176 }
0x1711   :  { %v2179_v59 = vsub.f32 %v2169_v48, %v2177_v57 }
0x1712   :  { %v2174_v61 = vpop.xlane.xlu1 %2173 }
0x1713   :  { %v2182_v62 = vmul.f32 1.442695, %v2179_v59  ;;  %v2178_v63 = vsub.f32 %v2164_v52, %v2174_v61 }
0x1715   :  { %3369 = vpow2.f32 %v2182_v62  ;;  %v2180_v0 = vmul.f32 1.442695, %v2178_v63 }
0x1717   :  { %3371 = vpow2.f32 %v2180_v0 }
0x1722   :  { %v3370_v4 = vpop.eup %3369 }
0x1723   :  { %v2187_v5 = vsel %vm432_vm6, %v3370_v4, 0.0 }
0x1724   :  { %v3372_v6 = vpop.eup %3371  ;;  %2188 = vadd.xlane.f32.xlu1 %v2187_v5 }
0x1725   :  { %v2184_v7 = vsel %vm432_vm6, %v3372_v6, 0.0 }
0x1726   :  { %2185 = vadd.xlane.f32.xlu0 %v2184_v7 }
0x1735   :  { %2194 = vrot.lane.b32.xlu1 %v4018_v19, %s3427_s28 }
0x1739   :  { %2287 = vrot.lane.b32.xlu1 %v4014_v28, %s3428_s29 }
0x173c   :  { %2196 = vrot.lane.b32.xlu0 %v4014_v28, %s3427_s28 }
0x173d   :  { %2281 = vrot.lane.b32.xlu1 %v4018_v19, %s4286_s2 }
0x1740   :  { %2285 = vrot.lane.b32.xlu0 %v4018_v19, %s3428_s29 }
0x1744   :  { %2283 = vrot.lane.b32.xlu0 %v4014_v28, %s4286_s2 }
0x17ad   :  { %v2189_v14 = vpop.xlane.xlu1 %2188 }
0x17ae   :  { %3373 = vrcp.f32 %v2189_v14 }
0x17af   :  { %v2186_v15 = vpop.xlane.xlu0 %2185 }
0x17b0   :  { %3375 = vrcp.f32 %v2186_v15 }
0x17b1   :  { %v2195_v16 = vpop.permute.xlu1 %2194 }
0x17b3   :  { %v2197_v31 = vpop.permute.xlu0 %2196 }
0x17b4   :  { %3226 = vmatprep.subr.mxu1 %v2197_v31 }
0x17b5   :  { %3227 = vmatpush3.msra.mxu1 %v2197_v31  ;;  %v2288_v17 = vpop.permute.xlu1 %2287 }
0x17b6   :  { %3228 = vmatprep.subr.mxu1 %v2195_v16 }
0x17b7   :  { %3229 = vmatpush3.msra.mxu1 %v2195_v16  ;;  %v2286_v49 = vpop.permute.xlu0 %2285 }
0x17b8   :  { %3233 = vmatprep.subr.msk.mxu1 %vm348_vm5, %v2288_v17 }
0x17b9   :  { %v2282_v48 = vpop.permute.xlu1 %2281 }
0x17bb   :  { %v3374_v18 = vpop.eup %3373  ;;  %v2284_v52 = vpop.permute.xlu0 %2283 }
0x17bc   :  { %v2193_v36 = vmul.f32 %v3374_v18, %v3370_v4 }
0x17bd   :  { %v3376_v30 = vpop.eup %3375 }
0x17be   :  { %v2192_v29 = vmul.f32 %v3376_v30, %v3372_v6 }
0x17c0   :  { %3230 = vmatprep.mubr.msk.f32.mxu1 %vm432_vm6, %v2192_v29 }
0x17c1   :  { %3231 = vmatmul.mubr.msk.f32.vlgmr.msra.gmra.mxu1 %vm432_vm6, %v2193_v36 }
0x17c2   :  { %3234 = vmatpush3.xpose.msk.msra.mxu1 %vm348_vm5, %v2288_v17  ;;  %3237 = vmatprep.mubr.msk.f32.mxu1 %vm348_vm5, %v2282_v48 }
0x17c3   :  { %3235 = vmatprep.subr.msk.mxu1 %vm348_vm5, %v2286_v49 }
0x17c6   :  { %3236 = vmatpush3.xpose.msk.msra.mxu1 %vm348_vm5, %v2286_v49 }
0x17c7   :  { %2668 = vmatprep.subr.mxu1 %v3788_v38 }
0x17c9   :  { %3238 = vmatmul.mubr.msk.f32.vlgmr.msra.gmra.mxu1 %vm348_vm5, %v2284_v52 }
0x17ca   :  { %2669 = vmatpush1.msra.mxu1 %v3793_v39  ;;  %2708 = vmatprep.mubr.f32.mxu1 %v3434_v42 }
0x17cb   :  { %2670 = vmatprep.subr.mxu1 %v3798_v40 }
0x17cc   :  { %2671 = vmatpush1.msra.mxu1 %v3804_v41 }
0x17cd   :  { %2672 = vmatprep.subr.mxu1 %v3811_v43 }
0x17ce   :  { %2673 = vmatpush1.msra.mxu1 %v3817_v44 }
0x17cf   :  { %2674 = vmatprep.subr.mxu1 %v3823_v45 }
0x17d0   :  { %2675 = vmatpush1.msra.mxu1 %v3829_v58 }
0x1881   :  { %v3232_v38 = vpop.f32.mrf.mxu1 }
0x1883   :  { %v2272_v53 = vpop.f32.mrf.mxu1 }
0x1889   :  { %v3239_v56 = vpop.f32.mrf.mxu1 }
0x188a   :  { %v2369_v57 = vadd.f32 %v4047_v46, %v3239_v56 }
0x188b   :  { %v2363_v39 = vpop.f32.mrf.mxu1 }
0x188c   :  { %v2364_v59 = vadd.f32 %v4053_v50, %v2363_v39  ;;  %v2375_v40 = vsel %vm432_vm6, %v2369_v57, -inf }
0x188d   :  { %2376 = vmax.xlane.f32.xlu0 %v2375_v40 }
0x188e   :  { %v2372_v41 = vsel %vm432_vm6, %v2364_v59, -inf }
0x188f   :  { %2373 = vmax.xlane.f32.xlu1 %v2372_v41 }
0x1916   :  { %v2377_v43 = vpop.xlane.xlu0 %2376 }
0x1917   :  { %v2379_v44 = vsub.f32 %v2369_v57, %v2377_v43 }
0x1918   :  { %v2374_v61 = vpop.xlane.xlu1 %2373 }
0x1919   :  { %v2382_v45 = vmul.f32 1.442695, %v2379_v44  ;;  %v2378_v62 = vsub.f32 %v2364_v59, %v2374_v61 }
0x191b   :  { %3377 = vpow2.f32 %v2382_v45  ;;  %v2380_v58 = vmul.f32 1.442695, %v2378_v62 }
0x191d   :  { %3379 = vpow2.f32 %v2380_v58 }
0x1928   :  { %v3378_v63 = vpop.eup %3377 }
0x1929   :  { %v2387_v46 = vsel %vm432_vm6, %v3378_v63, 0.0 }
0x192a   :  { %v3380_v0 = vpop.eup %3379  ;;  %2388 = vadd.xlane.f32.xlu1 %v2387_v46 }
0x192b   :  { %v2384_v50 = vsel %vm432_vm6, %v3380_v0, 0.0 }
0x192c   :  { %2385 = vadd.xlane.f32.xlu0 %v2384_v50 }
0x193b   :  { %2394 = vrot.lane.b32.xlu1 %v4018_v19, %s4287_s25 }
0x193f   :  { %2483 = vrot.lane.b32.xlu1 %v4098_v10, %s4288_s26 }
0x1942   :  { %2396 = vrot.lane.b32.xlu0 %v4014_v28, %s4287_s25 }
0x1943   :  { %2491 = vrot.lane.b32.xlu1 %v2272_v53, %s4289_s27 }
0x1946   :  { %2485 = vrot.lane.b32.xlu0 %v4096_v35, %s4288_s26  ;;  %v3397_v35 = vld [vmem:[%s4263_s7 + $0x10] sm:$0xff]  ;;  %s3436_s7 = smov [#allocation2]  }
0x194a   :  { %2493 = vrot.lane.b32.xlu0 %v3232_v38, %s4289_s27 }
0x19b3   :  { %v2389_v4 = vpop.xlane.xlu1 %2388 }
0x19b4   :  { %3381 = vrcp.f32 %v2389_v4 }
0x19b5   :  { %v2386_v5 = vpop.xlane.xlu0 %2385 }
0x19b6   :  { %3383 = vrcp.f32 %v2386_v5 }
0x19b7   :  { %v2395_v19 = vpop.permute.xlu1 %2394 }
0x19b9   :  { %v2397_v6 = vpop.permute.xlu0 %2396 }
0x19ba   :  { %3240 = vmatprep.subr.mxu0 %v2397_v6 }
0x19bb   :  { %3241 = vmatpush3.msra.mxu0 %v2397_v6  ;;  %v2484_v16 = vpop.permute.xlu1 %2483 }
0x19bc   :  { %3242 = vmatprep.subr.mxu0 %v2395_v19  ;;  %v2505_v18 = vsel %vm348_vm5, %v4094_v11, %v2484_v16 }
0x19bd   :  { %3243 = vmatpush3.msra.mxu0 %v2395_v19 }
0x19be   :  { %3247 = vmatprep.subr.mxu0 %v3730_v54 }
0x19bf   :  { %v2492_v17 = vpop.permute.xlu1 %2491 }
0x19c1   :  { %v3382_v28 = vpop.eup %3381 }
0x19c2   :  { %v2393_v14 = vmul.f32 %v3382_v28, %v3378_v63 }
0x19c3   :  { %v3384_v10 = vpop.eup %3383 }
0x19c4   :  { %v2392_v7 = vmul.f32 %v3384_v10, %v3380_v0 }
0x19c6   :  { %3244 = vmatprep.mubr.msk.f32.mxu0 %vm432_vm6, %v2392_v7 }
0x19c7   :  { %3245 = vmatmul.mubr.msk.f32.vlgmr.msra.gmra.mxu0 %vm432_vm6, %v2393_v14 }
0x19c8   :  { %3248 = vmatpush3.msra.mxu0 %v3730_v54 }
0x19c9   :  { %3249 = vmatprep.subr.mxu0 %v3735_v1  ;;  %v2486_v1 = vpop.permute.xlu0 %2485 }
0x19ca   :  { %3250 = vmatpush3.msra.mxu0 %v3397_v35  ;;  %v2506_v30 = vsel %vm348_vm5, %v4092_v34, %v2486_v1 }
0x19cb   :  { %3251 = vmatprep.subr.mxu0 %v3744_v2 }
0x19cc   :  { %3252 = vmatpush3.msra.mxu0 %v3744_v2 }
0x19cd   :  { %3253 = vmatprep.subr.mxu0 %v3751_v3  ;;  %v2494_v31 = vpop.permute.xlu0 %2493 }
0x19ce   :  { %3254 = vmatpush3.msra.mxu0 %v3751_v3  ;;  %v2507_v3 = vsel %vm432_vm6, %v2505_v18, %v2492_v17  ;;  %v2508_v36 = vsel %vm432_vm6, %v2506_v30, %v2494_v31 }
0x19cf   :  { %3258 = vmatprep.subr.mxu0 %v3875_v24 }
0x1a87   :  { %v3246_v15 = vpop.f32.mrf.mxu0 }
0x1a88   :  { %2501 = vrot.lane.b32.xlu0 %v3246_v15, %s4290_s20 }
0x1a89   :  { %v2472_v54 = vpop.f32.mrf.mxu0 }
0x1a8a   :  { %2499 = vrot.lane.b32.xlu1 %v2472_v54, %s4290_s20 }
0x1afa   :  { %v2502_v2 = vpop.permute.xlu0 %2501 }
0x1afb   :  { %v2510_v49 = vsel %vm1170_vm7, %v2508_v36, %v2502_v2 }
0x1afc   :  { %v2500_v29 = vpop.permute.xlu1 %2499 }
0x1afd   :  { %v2509_v48 = vsel %vm1170_vm7, %v2507_v3, %v2500_v29 }
0x1afe   :  { %3255 = vmatprep.mubr.msk.f32.mxu0 %vm134_vm0, %v2509_v48 }
0x1aff   :  { %3256 = vmatmul.mubr.msk.f32.vlgmr.msra.gmra.mxu0 %vm134_vm0, %v2510_v49 }
0x1b00   :  { %3259 = vmatpush3.msra.mxu0 %v3875_v24 }
0x1b01   :  { %3260 = vmatprep.subr.mxu0 %v3880_v20 }
0x1b02   :  { %3261 = vmatpush3.msra.mxu0 %v3880_v20 }
0x1b03   :  { %3262 = vmatprep.subr.mxu0 %v3887_v25 }
0x1b04   :  { %3263 = vmatpush3.msra.mxu0 %v3887_v25 }
0x1b05   :  { %3264 = vmatprep.subr.mxu0 %v3896_v26 }
0x1b06   :  { %3265 = vmatpush3.msra.mxu0 %v3896_v26 }
0x1b07   :  { %3266 = vmatprep.subr.mxu0 %v3903_v27 }
0x1b08   :  { %3267 = vmatpush3.msra.mxu0 %v3903_v27 }
0x1b09   :  { %3268 = vmatprep.subr.mxu0 %v3910_v21 }
0x1b0a   :  { %3269 = vmatpush3.msra.mxu0 %v3910_v21 }
0x1b0b   :  { %3270 = vmatprep.subr.mxu0 %v3917_v22 }
0x1b0c   :  { %3271 = vmatpush3.msra.mxu0 %v3917_v22 }
0x1b0d   :  { %3272 = vmatprep.subr.mxu0 %v3924_v23 }
0x1b0e   :  { %3273 = vmatpush3.msra.mxu0 %v3924_v23 }
0x1bbf   :  { %v3257_v24 = vpop.f32.mrf.mxu0 }
0x1bc0   :  { %v4192_v20 = vadd.f32 %v3257_v24, %v3994_v9 }
0x1bc1   :  { %v2583_v25 = vpop.f32.mrf.mxu0 }
0x1bc2   :  { %v4195_v26 = vadd.f32 %v2583_v25, %v3996_v12  ;;  %v2597_v27 = vsel %vm134_vm0, %v4192_v20, 0.0 }
0x1bc3   :  { %2598 = vadd.xlane.f32.xlu0 %v2597_v27 }
0x1bc4   :  { %v2594_v21 = vsel %vm134_vm0, %v4195_v26, 0.0 }
0x1bc5   :  { %2595 = vadd.xlane.f32.xlu1 %v2594_v21 }
0x1c4c   :  { %v2599_v22 = vpop.xlane.xlu0 %2598 }
0x1c4d   :  { %v2601_v34 = vmul.f32 0.03125, %v2599_v22 }
0x1c4e   :  { %v2596_v11 = vpop.xlane.xlu1 %2595 }
0x1c4f   :  { %v2603_v23 = vsub.f32 %v4192_v20, %v2601_v34  ;;  %v2600_v52 = vmul.f32 0.03125, %v2596_v11 }
0x1c51   :  { %v2602_v9 = vsub.f32 %v4195_v26, %v2600_v52  ;;  %v2605_v38 = vmul.f32 %v2603_v23, %v2603_v23  ;;  %v2633_v28 = vmul.f32 %v3850_v8, %v2603_v23 }
0x1c53   :  { %v2609_v12 = vsel %vm134_vm0, %v2605_v38, 0.0  ;;  %v2604_v53 = vmul.f32 %v2602_v9, %v2602_v9  ;;  %v2632_v6 = vmul.f32 %v3850_v8, %v2602_v9 }
0x1c54   :  { %2610 = vadd.xlane.f32.xlu1 %v2609_v12 }
0x1c55   :  { %v2606_v56 = vsel %vm134_vm0, %v2604_v53, 0.0 }
0x1c56   :  { %2607 = vadd.xlane.f32.xlu0 %v2606_v56 }
0x1cdd   :  { %v2611_v57 = vpop.xlane.xlu1 %2610 }
0x1cde   :  { %v2613_v39 = vmul.f32 0.032258064, %v2611_v57 }
0x1cdf   :  { %v2608_v59 = vpop.xlane.xlu0 %2607 }
0x1ce0   :  { %3385 = vrsqrt.f32 %v2613_v39  ;;  %v2612_v40 = vmul.f32 0.032258064, %v2608_v59  ;;  %vm2623_vm4 = vcmp.eq.f32.partialorder %v2613_v39, inf  ;;  %v2626_v44 = vand.u32 2147483648, %v2613_v39 }
0x1ce1   :  { %vm2625_vm5 = vcmp.eq.f32.partialorder %v2613_v39, 0.0 }
0x1ce2   :  { %3387 = vrsqrt.f32 %v2612_v40  ;;  %vm2616_vm6 = vcmp.eq.f32.partialorder %v2612_v40, inf  ;;  %v2619_v46 = vand.u32 2147483648, %v2612_v40  ;;  %vm2618_vm7 = vcmp.eq.f32.partialorder %v2612_v40, 0.0 }
0x1ced   :  { %v3386_v41 = vpop.eup %3385 }
0x1cee   :  { %v2622_v43 = vmul.f32 %v3386_v41, %v2613_v39 }
0x1cef   :  { %v3388_v61 = vpop.eup %3387 }
0x1cf0   :  { %v2624_v45 = vsel %vm2623_vm4, %v2613_v39, %v2622_v43  ;;  %v2615_v58 = vmul.f32 %v3388_v61, %v2612_v40 }
0x1cf1   :  { %v2627_v62 = vsel %vm2625_vm5, %v2626_v44, %v2624_v45 }
0x1cf2   :  { %v2629_v63 = vadd.f32 1e-06, %v2627_v62  ;;  %v2617_v0 = vsel %vm2616_vm6, %v2612_v40, %v2615_v58 }
0x1cf3   :  { %v2620_v50 = vsel %vm2618_vm7, %v2619_v46, %v2617_v0 }
0x1cf4   :  { %v2628_v4 = vadd.f32 1e-06, %v2620_v50  ;;  %3389 = vrcp.f32 %v2629_v63 }
0x1cf6   :  { %3391 = vrcp.f32 %v2628_v4 }
0x1d01   :  { %v3390_v5 = vpop.eup %3389 }
0x1d02   :  { %v2635_v14 = vmul.f32 %v3390_v5, %v2633_v28 }
0x1d03   :  { %v3392_v19 = vpop.eup %3391 }
0x1d04   :  { %v2634_v10 = vmul.f32 %v3392_v19, %v2632_v6  ;;  %v2637_v35 = vadd.f32 %v3856_v13, %v2635_v14 }
0x1d06   :  { %v2636_v7 = vadd.f32 %v3856_v13, %v2634_v10 }
0x1d08   :  { %2954 = vmatmul.mubr.msk.f32.vlgmr.msra.gmra.mxu1 %vm134_vm0, %v2636_v7 }
0x1d09   :  { %2714 = vmatprep.mubr.f32.mxu1 %v3434_v42 }
0x1d0c   :  { %2955 = vmatmul.mubr.msk.f32.gmra.mxu1 %vm134_vm0, %v2637_v35 }
0x1dc8   :  { %v2710_v15 = vpop.f32.mrf.mxu1 }
0x1dc9   :  { %2731 = vrot.lane.b32.xlu0 %v2710_v15, %s3421_s5  ;;  %v2721_v16 = vrot.slane %v2710_v15, 7 }
0x1dca   :  { %v2712_v54 = vpop.f32.mrf.mxu1 }
0x1dcb   :  { %v2739_v2 = vrot.slane %v2712_v54, 1 }
0x1dcc   :  { %v2716_v1 = vpop.f32.mrf.mxu1 }
0x1dcd   :  { %v2722_v31 = vrot.slane %v2716_v1, 7  ;;  %2733 = vrot.lane.b32.xlu1 %v2716_v1, %s3421_s5 }
0x1dce   :  { %v2718_v42 = vpop.f32.mrf.mxu1 }
0x1dcf   :  { %v2724_v8 = vsel %vm1387_vm12, %v2722_v31, %v2721_v16  ;;  %v2723_v17 = vsel %vm1387_vm12, %v2721_v16, %v2722_v31  ;;  %v2740_v18 = vrot.slane %v2718_v42, 1 }
0x1dd0   :  { %v2725_v13 = vmul.f32 %v2724_v8, %v3941_v47  ;;  %v2726_v29 = vmul.f32 %v2723_v17, %v3937_v37 }
0x1dd1   :  { %v2741_v30 = vsel %vm1416_vm13, %v2739_v2, %v2740_v18  ;;  %v2742_v24 = vsel %vm1416_vm13, %v2740_v18, %v2739_v2 }
0x1dd2   :  { %v2727_v3 = vadd.f32 %v3950_v51, %v2725_v13  ;;  %v2743_v49 = vmul.f32 %v2741_v30, %v3939_v60  ;;  %v2728_v27 = vadd.f32 %v3950_v51, %v2726_v29  ;;  %v2744_v11 = vmul.f32 %v2742_v24, %v3945_v55 }
0x1e3b   :  { %v2732_v36 = vpop.permute.xlu0 %2731 }
0x1e3c   :  { %v2737_v48 = vadd.f32 %v2732_v36, %v2727_v3 }
0x1e3e   :  { %v2745_v25 = vadd.f32 %v2743_v49, %v2737_v48 }
0x1e3f   :  { %v2734_v21 = vpop.permute.xlu1 %2733 }
0x1e40   :  { %v2747_v22 = vmax.f32 %v2745_v25, 0.0  ;;  %v2738_v34 = vadd.f32 %v2734_v21, %v2728_v27 }
0x1e42   :  { %v2746_v23 = vadd.f32 %v2744_v11, %v2738_v34  ;;  %3274 = vmatprep.mubr.msk.f32.mxu0 %vm1435_vm14, %v2747_v22 }
0x1e44   :  { %v2748_v52 = vmax.f32 %v2746_v23, 0.0 }
0x1e46   :  { %3275 = vmatmul.mubr.msk.f32.vlgmr.msra.gmra.mxu0 %vm1435_vm14, %v2748_v52 }
0x1f06   :  { %v3276_v9 = vpop.f32.mrf.mxu0 }
0x1f07   :  { %2850 = vrot.lane.b32.xlu0 %v3276_v9, %s3421_s5  ;;  %v2831_v12 = vrot.slane %v3276_v9, 7 }
0x1f08   :  { %v2821_v38 = vpop.f32.mrf.mxu0 }
0x1f09   :  { %v2830_v53 = vrot.slane %v2821_v38, 7  ;;  %2848 = vrot.lane.b32.xlu1 %v2821_v38, %s3421_s5 }
0x1f0b   :  { %2842 = vrot.lane.b32.xlu0 %v3276_v9, %s3420_s18  ;;  %v2832_v51 = vsel %vm1387_vm12, %v2830_v53, %v2831_v12  ;;  %v2833_v56 = vsel %vm1387_vm12, %v2831_v12, %v2830_v53 }
0x1f0c   :  { %v2835_v57 = vmul.f32 %v2832_v51, %v3937_v37  ;;  %v2834_v59 = vmul.f32 %v2833_v56, %v3941_v47 }
0x1f0d   :  { %2840 = vrot.lane.b32.xlu1 %v2821_v38, %s3420_s18  ;;  %s2873_s18 = sshll.u32 %s3436_s7, 4  ;;  %s2874_s18 = int_to_ptr.vmem [resolvable:$true] %s2873_s18 }
0x1f0e   :  { %v2837_v44 = vadd.f32 %v3975_v33, %v2835_v57  ;;  %v2836_v63 = vadd.f32 %v3975_v33, %v2834_v59  ;;  %s3398_s5 = scalar_lea.vmem %s2874_s18, 256  ;;  %p3403_p1 = scmp.lt.s32.totalorder %s2874_s18, %s2874_s18 }
0x1f0f   :  { %p3399_p0 = scmp.ne.s32.totalorder %s2874_s18, %s3398_s5  ;;  %p3404_p2 = scmp.lt.s32.totalorder %s3398_s5, %s3398_s5 }
0x1f11   :  { %p3405_p3 = por %p3404_p2, %p3403_p1 }
0x1f13   :  { %p3406_p4 = pnand %p3405_p3, %p3399_p0 }
0x1f79   :  { %v2851_v39 = vpop.permute.xlu0 %2850 }
0x1f7a   :  { %v2855_v41 = vrot.slane %v2851_v39, 1 }
0x1f7b   :  { %v2849_v40 = vpop.permute.xlu1 %2848 }
0x1f7c   :  { %v2854_v43 = vrot.slane %v2849_v40, 1 }
0x1f7d   :  { %v2843_v61 = vpop.permute.xlu0 %2842 }
0x1f7e   :  { %v2856_v45 = vsel %vm1416_vm13, %v2854_v43, %v2855_v41  ;;  %v2857_v62 = vsel %vm1416_vm13, %v2855_v41, %v2854_v43  ;;  %v2847_v58 = vadd.f32 %v2843_v61, %v2837_v44 }
0x1f7f   :  { %v2859_v37 = vmul.f32 %v2857_v62, %v3945_v55  ;;  %v2858_v46 = vmul.f32 %v2856_v45, %v3939_v60  ;;  %v2841_v47 = vpop.permute.xlu1 %2840 }
0x1f80   :  { %v2846_v0 = vadd.f32 %v2841_v47, %v2836_v63 }
0x1f81   :  { %v2861_v50 = vadd.f32 %v2859_v37, %v2847_v58 }
0x1f82   :  { %v2860_v4 = vadd.f32 %v2858_v46, %v2846_v0 }
0x1f83   :  { %v2863_v5 = vmax.f32 %v2861_v50, 0.0 }
0x1f84   :  { %v2862_v6 = vmax.f32 %v2860_v4, 0.0 }
0x1f85   :  { %v2865_v19 = vadd.f32 %v2863_v5, %v4192_v20 }
0x1f86   :  { %v2864_v32 = vadd.f32 %v2862_v6, %v4195_v26 }
0x1f87   :  { %2867 = vst.msk [vmem:[#allocation2 + $0x8] sm:$0xff] %vm134_vm0, %v2865_v19 }
0x1f88   :  { %2866 = vst.msk [vmem:[#allocation2] sm:$0xff] %vm134_vm0, %v2864_v32 }
0x1f89   :  { %3409 = shalt.err (!%p3406_p4)
}
0x1f8a   :  { %s3437_s0 = smov 128  }
0x1f8b   :  { %2879 = dma.vmem_to_hbm [thread:$0]  %s2874_s18, 256, %s4272_s16, [#allocation3], %s3437_s0, %s3437_s0, %s4288_s26  }
0x1f8c   :  { %3418 = dma.done.wait [#allocation3], 256  }
0x1f8d   :  { %3419 = vsyncadd [#allocation3], 4294967040 }
0x1f8e   :  { %2883 = vsyncpa [#allocation3], 1 }

</bundles_post_ra>
